<compile_context>
chip_gen: v7x
topology: tpu7x:2x2x1
jax: 0.10.0
libtpu: 0.0.40
codegen_flags: <defaults>
</compile_context>

<pallas_src>
import numpy as np
import jax
import jax.numpy as jnp
from jax import lax
from jax.experimental import pallas as pl
from jax.experimental.pallas import tpu as pltpu


# ----------------------------------------------------------------------------
# Pallas kernel + wrapper
# ----------------------------------------------------------------------------
def edge_feature_attention(node, edge, mask, P, block_b=None,
                           precision=lax.Precision.DEFAULT):
    f32 = jnp.float32
    B, N, Din = node.shape
    De = edge.shape[-1]
    D = P["w_emb"].shape[1]           # node embedding dim (32)
    F = P["w_fus"].shape[1]           # fusion dim (64) == 2*D
    NN = N * N
    K = int(P["aca"].shape[0])        # number of asymmetric-conv layers

    # ---- batch tiling: >=2 grid steps when possible (v7x megacore), while ----
    # ---- keeping block_b*NN near the MXU M dimension -------------------------
    if block_b is None:
        if B >= 2:
            block_b = max(1, min(B // 2, max(1, 256 // NN)))
        else:
            block_b = B
        while B % block_b:
            block_b -= 1
    assert B % block_b == 0
    BN, BNN = block_b * N, block_b * NN
    KP = 8                            # padded contraction width for node/edge feats

    # ---- data: flatten batch into rows; zero-pad tiny feature dims to KP -----
    node_f = jnp.zeros((B * N, KP), f32).at[:, :Din].set(
        node.reshape(B * N, Din).astype(f32))
    edge_f = jnp.zeros((B * NN, KP), f32).at[:, :De].set(
        edge.reshape(B * NN, De).astype(f32))
    mask_m = mask.reshape(B * N, N).astype(f32)
    mask_f = mask.reshape(B * NN, 1).astype(f32)

    # ---- one packed weight slab (all row offsets are multiples of 8) ---------
    def r8(n):
        return ((n + 7) // 8) * 8

    entries = [("w_emb", KP), ("b_emb", 1), ("w_h12", D), ("b_h12", 1),
               ("w_edge", KP), ("w_fus", F), ("w_ch", F), ("b_ch", 1), ("w_fout", 1)]
    offs, row = {}, 0
    for name, r in entries:
        offs[name] = row
        row += r8(r)
    slab_rows = row

    w_h12 = jnp.concatenate([P["w_h1"], P["w_h2"]], axis=1)       # (D, 2D)
    b_h12 = jnp.concatenate([P["b_h1"], P["b_h2"]], axis=1)       # (1, 2D)

    slab = jnp.zeros((slab_rows, F), f32)

    def put(s, name, arr):
        arr = jnp.asarray(arr, f32)
        r, c = arr.shape
        return s.at[offs[name]:offs[name] + r, :c].set(arr)

    slab = put(slab, "w_emb", P["w_emb"])
    slab = put(slab, "b_emb", P["b_emb"])
    slab = put(slab, "w_h12", w_h12)
    slab = put(slab, "b_h12", b_h12)
    slab = put(slab, "w_edge", P["w_edge"])
    slab = put(slab, "w_fus", P["w_fus"])
    slab = put(slab, "w_ch", P["w_ch"])
    slab = put(slab, "b_ch", P["b_ch"])
    slab = put(slab, "w_fout", P["w_fout"])

    # ---- fold the (3,1)/(1,3) asymmetric convs into fused block operators ----
    hi = lax.Precision.HIGHEST        # exact constant folding, independent of flags
    rr = np.arange(N)
    Dm = (rr[None, :] == rr[:, None] - 1).astype(np.float32)      # picks x[h-1]
    Um = (rr[None, :] == rr[:, None] + 1).astype(np.float32)      # picks x[h+1]
    Id = np.eye(N, dtype=np.float32)
    taps_h = jnp.asarray(np.stack([Dm, Id, Um]))                  # left-mul taps
    taps_w = jnp.asarray(np.stack([Um, Id, Dm]))                  # right-mul taps
    eyeB = jnp.asarray(np.eye(block_b, dtype=np.float32))
    zeros2 = jnp.zeros((2, N, N), f32)

    T = jnp.einsum('koct,tij->kocij', P["c1w"], taps_h, precision=hi)    # (K,2,2,N,N)
    To = jnp.einsum('ct,tij->cij', P["oc1w"], taps_h, precision=hi)      # (2,N,N)
    T_all = jnp.concatenate([T, jnp.stack([To, zeros2])[None]], axis=0)  # (K+1,2,2,N,N)
    S = jnp.einsum('koct,tij->kocij', P["c2w"], taps_w, precision=hi)
    So = jnp.einsum('ct,tij->cij', P["oc2w"], taps_w, precision=hi)
    S_all = jnp.concatenate([S, jnp.stack([So, zeros2])[None]], axis=0)

    # batch-block-diagonal, both output channels stacked into one operator
    TB = jnp.einsum('ab,kocij->kocaibj', eyeB, T_all,
                    precision=hi).reshape(K + 1, 2, 2, BN, BN)
    L_full = jnp.transpose(TB, (0, 1, 3, 2, 4)).reshape(K + 1, 2 * BN, 2 * BN)
    R_full = jnp.transpose(S_all, (0, 2, 3, 1, 4)).reshape(K + 1, 2 * N, 2 * N)

    # ---- all per-layer scalars packed into ONE SMEM vector --------------------
    scal = jnp.concatenate([
        jnp.reshape(P["a_fus"], (-1,)), jnp.reshape(P["cha"], (-1,)),
        jnp.reshape(P["aca"], (-1,)), jnp.reshape(P["c2b"], (-1,)),
        jnp.reshape(P["oc2b"], (-1,)), jnp.reshape(P["oa"], (-1,)),
        jnp.reshape(P["oscw"], (-1,)),
    ]).astype(f32)
    I_AFUS, I_CHA, I_ACA, I_C2B = 0, 1, 2, 2 + K
    I_OC2B, I_OA, I_OSCW = 2 + 3 * K, 3 + 3 * K, 4 + 3 * K

    def kernel(node_ref, edge_ref, maskm_ref, maskf_ref, slab_ref,
               L_ref, R_ref, scal_ref, out_ref):

        def mm(a, b):
            return jnp.dot(a, b, preferred_element_type=f32, precision=precision)

        def prelu(x, a):
            return jnp.where(x >= 0, x, x * a)

        def wblk(name, rows, cols):
            o = offs[name]
            return slab_ref[o:o + rows, :cols]

        nodes = node_ref[...]            # (BN, KP)
        edges = edge_ref[...]            # (BNN, KP)
        mskm = maskm_ref[...]            # (BN, N)
        mskf = maskf_ref[...]            # (BNN, 1)

        # ---- embeddings (batch folded into the matmul M dimension) -----------
        ne = mm(nodes, wblk("w_emb", KP, D)) + wblk("b_emb", 1, D)        # (BN, D)
        h12 = mm(ne, wblk("w_h12", D, 2 * D)) + wblk("b_h12", 1, 2 * D)   # (BN, 2D)
        ee = mm(edges, wblk("w_edge", KP, D))                             # (BNN, D)

        # exact pair expansion (replaces one-hot selector matmuls)
        h1 = h12[:, :D]
        h2 = h12[:, D:]
        h1_pair = jnp.broadcast_to(h1.reshape(BN, 1, D), (BN, N, D)).reshape(BNN, D)
        h2_pair = jnp.broadcast_to(h2.reshape(block_b, 1, N, D),
                                   (block_b, N, N, D)).reshape(BNN, D)
        prod = h1_pair * h2_pair * mskf                                   # (BNN, D)

        hn = prelu(mm(jnp.concatenate([prod, ee], axis=1), wblk("w_fus", F, F)),
                   scal_ref[I_AFUS])                                      # (BNN, F)

        # ---- ChannelFeatures ---------------------------------------------------
        hn_b = hn.reshape(block_b, NN, F)
        pooled = jnp.concatenate([jnp.max(hn_b, axis=1), jnp.mean(hn_b, axis=1)],
                                 axis=0)                                  # (2*block_b, F)
        cb = prelu(mm(pooled, wblk("w_ch", F, F)) + wblk("b_ch", 1, F),
                   scal_ref[I_CHA]) + pooled
        ch_score = jax.nn.sigmoid(cb[:block_b] + cb[block_b:])            # (block_b, F)

        # ---- per-pair scalars reduced straight into (BN, N) maps --------------
        wf = wblk("w_fout", 1, F)                                         # (1, F)
        hn4 = hn.reshape(block_b, N, N, F)
        U = hn4 * wf
        avg_map = jnp.mean(hn4, axis=-1).reshape(BN, N)
        max_map = jnp.max(hn4, axis=-1).reshape(BN, N)
        g_map = jnp.sum(U, axis=-1).reshape(BN, N)
        h_map = jnp.sum(U * ch_score.reshape(block_b, 1, 1, F),
                        axis=-1).reshape(BN, N)

        # ---- SpatialFeatures: fused block-tridiagonal left/right operators ----
        x0, x1 = avg_map, max_map
        for k in range(K):
            xr = jnp.concatenate([x0, x1], axis=0)                        # (2BN, N)
            xc = jnp.concatenate([x0, x1], axis=1)                        # (BN, 2N)
            left = mm(L_ref[k], xr)                                       # (2BN, N)
            right = mm(xc, R_ref[k])                                      # (BN, 2N)
            a_k = scal_ref[I_ACA + k]
            y0 = left[:BN] + right[:, :N] + scal_ref[I_C2B + 2 * k + 0]
            y1 = left[BN:] + right[:, N:] + scal_ref[I_C2B + 2 * k + 1]
            x0 = prelu(y0, a_k) * mskm + x0
            x1 = prelu(y1, a_k) * mskm + x1
        xr = jnp.concatenate([x0, x1], axis=0)
        xc = jnp.concatenate([x0, x1], axis=1)
        y = mm(L_ref[K], xr)[:BN] + mm(xc, R_ref[K])[:, :N] + scal_ref[I_OC2B]
        shortcut = scal_ref[I_OSCW] * x0 + scal_ref[I_OSCW + 1] * x1
        spat_score = jax.nn.sigmoid(prelu(y, scal_ref[I_OA]) * mskm + shortcut)

        # ---- fusion_out + masked softmax ---------------------------------------
        fusion = spat_score * g_map + h_map                               # (BN, N)
        att = jnp.where(fusion != 0.0, fusion, jnp.full_like(fusion, -9e20))
        m = jnp.max(att, axis=-1, keepdims=True)
        e = jnp.exp(att - m)
        denom = jnp.sum(e, axis=-1, keepdims=True)
        out_ref[...] = e * pl.reciprocal(denom, approx=True)

    smem_spec = pl.BlockSpec(memory_space=pltpu.MemorySpace.SMEM)
    grid_spec = pltpu.PrefetchScalarGridSpec(
        num_scalar_prefetch=0,
        grid=(B // block_b,),
        in_specs=[
            pl.BlockSpec((BN, KP), lambda g: (g, 0)),
            pl.BlockSpec((BNN, KP), lambda g: (g, 0)),
            pl.BlockSpec((BN, N), lambda g: (g, 0)),
            pl.BlockSpec((BNN, 1), lambda g: (g, 0)),
            pl.BlockSpec((slab_rows, F), lambda g: (0, 0)),
            pl.BlockSpec((K + 1, 2 * BN, 2 * BN), lambda g: (0, 0, 0)),
            pl.BlockSpec((K + 1, 2 * N, 2 * N), lambda g: (0, 0, 0)),
            smem_spec,
        ],
        out_specs=pl.BlockSpec((BN, N), lambda g: (g, 0)),
    )

    out_flat = pl.pallas_call(
        kernel,
        grid_spec=grid_spec,
        out_shape=jax.ShapeDtypeStruct((B * N, N), f32),
        compiler_params=pltpu.CompilerParams(dimension_semantics=("parallel",)),
    )(node_f, edge_f, mask_m, mask_f, slab, L_full, R_full, scal)

    return out_flat.reshape(B, N, N)


# ----------------------------------------------------------------------------
# Pure-JAX reference (faithful to the PyTorch forward) for validation
# ----------------------------------------------------------------------------
def reference_forward(node, edge, mask, P, conv_num):
    def prelu(x, a):
        return jnp.where(x >= 0, x, a * x)

    ne = node @ P["w_emb"] + P["b_emb"]                 # (B,N,D)
    ee = edge @ P["w_edge"]                             # (B,N,N,D)
    h1 = ne @ P["w_h1"] + P["b_h1"]
    h2 = ne @ P["w_h2"] + P["b_h2"]
    hn1 = h1[:, :, None, :]
    hn2 = h2[:, None, :, :]
    x = jnp.concatenate([hn1 * hn2 * mask[..., None], ee], axis=-1)
    hn = prelu(x @ P["w_fus"], P["a_fus"][0])           # (B,N,N,F)

    def conv2d(x, w, pad, bias=None):
        y = lax.conv_general_dilated(x, w, (1, 1), pad,
                                     dimension_numbers=("NCHW", "OIHW", "NCHW"))
        if bias is not None:
            y = y + bias[None, :, None, None]
        return y

    def asym(x, w1, w2, b2, a, wsc):
        x1 = conv2d(x, w1[:, :, :, None], [(1, 1), (0, 0)])
        x2 = conv2d(x, w2[:, :, None, :], [(0, 0), (1, 1)], b2)
        sc = x if wsc is None else conv2d(x, wsc[None, :, None, None], [(0, 0), (0, 0)])
        z = prelu(x1 + x2, a) * mask[:, None, :, :]
        return z + sc

    # SpatialFeatures
    feat = jnp.stack([jnp.mean(hn, axis=-1), jnp.max(hn, axis=-1)], axis=1)  # (B,2,N,N)
    for k in range(conv_num):
        feat = asym(feat, P["c1w"][k], P["c2w"][k], P["c2b"][k], P["aca"][k], None)
    out = asym(feat, P["oc1w"][None], P["oc2w"][None], P["oc2b"], P["oa"][0], P["oscw"])
    spat_score = jax.nn.sigmoid(out[:, 0])              # (B,N,N)
    spatial_feats = spat_score[..., None] * hn

    # ChannelFeatures (conv_num = 1, both branches use conv1 — replicating torch code)
    mean_c = jnp.mean(hn, axis=(1, 2))
    max_c = jnp.max(hn, axis=(1, 2))

    def cb(v):
        return prelu(v @ P["w_ch"] + P["b_ch"], P["cha"][0]) + v

    ch_score = jax.nn.sigmoid(cb(max_c) + cb(mean_c))   # (B,F)
    channel_feats = hn * ch_score[:, None, None, :]

    fusion = (spatial_feats + channel_feats) @ P["w_fout"][0]    # (B,N,N)
    att = jnp.where(fusion != 0.0, fusion, jnp.full_like(fusion, -9e20))
    return jax.nn.softmax(att, axis=-1)


# ----------------------------------------------------------------------------
if __name__ == "__main__":
    # Global HIGHEST keeps the pure-JAX reference (and wrapper constant folding)
    # f32-accurate; the kernel's matmuls explicitly request DEFAULT precision.
    jax.config.update("jax_default_matmul_precision", "highest")

    B, N = 2, 8
    IN_DIMS, IN_EDGE_DIMS, OUT_DIMS, CONV_NUM = 2, 5, 32, 7
    F = 2 * OUT_DIMS

    key = jax.random.PRNGKey(0)
    ks = jax.random.split(key, 24)

    def w(k, shape, fan_in):
        return (jax.random.normal(k, shape, jnp.float32) * (fan_in ** -0.5)).astype(jnp.float32)

    P = {
        "w_emb": w(ks[0], (IN_DIMS, OUT_DIMS), IN_DIMS),
        "b_emb": w(ks[1], (1, OUT_DIMS), IN_DIMS),
        "w_h1": w(ks[2], (OUT_DIMS, OUT_DIMS), OUT_DIMS),
        "b_h1": w(ks[3], (1, OUT_DIMS), OUT_DIMS),
        "w_h2": w(ks[4], (OUT_DIMS, OUT_DIMS), OUT_DIMS),
        "b_h2": w(ks[5], (1, OUT_DIMS), OUT_DIMS),
        "w_edge": w(ks[6], (IN_EDGE_DIMS, OUT_DIMS), IN_EDGE_DIMS),
        "w_fus": w(ks[7], (F, F), F),
        "a_fus": jnp.full((1,), 0.25, jnp.float32),
        "c1w": w(ks[8], (CONV_NUM, 2, 2, 3), 6),       # (layer, out_ch, in_ch, kH) for (3,1) conv
        "c2w": w(ks[9], (CONV_NUM, 2, 2, 3), 6),       # (layer, out_ch, in_ch, kW) for (1,3) conv
        "c2b": w(ks[10], (CONV_NUM, 2), 6),
        "aca": jnp.full((CONV_NUM,), 0.25, jnp.float32),
        "oc1w": w(ks[11], (2, 3), 6),                  # conv_out (3,1), out_ch=1 squeezed
        "oc2w": w(ks[12], (2, 3), 6),
        "oc2b": w(ks[13], (1,), 6),
        "oc2b_": None,
        "oscw": w(ks[14], (2,), 2),                    # conv_out 1x1 shortcut weights
        "oa": jnp.full((1,), 0.25, jnp.float32),
        "w_ch": w(ks[15], (F, F), F),
        "b_ch": w(ks[16], (1, F), F),
        "cha": jnp.full((1,), 0.25, jnp.float32),
        "w_fout": w(ks[17], (1, F), F),
    }
    del P["oc2b_"]

    node = jax.random.normal(ks[18], (B, N, IN_DIMS), jnp.float32)
    edge = jax.random.normal(ks[19], (B, N, N, IN_EDGE_DIMS), jnp.float32)
    mask = (jax.random.uniform(ks[20], (B, N, N)) < 0.7).astype(jnp.float32)

    # fast path: bf16 MXU passes (DEFAULT precision)
    out = edge_feature_attention(node, edge, mask, P)
    out = jax.block_until_ready(out)
    assert out.shape == (B, N, N)

    ref = reference_forward(node, edge, mask, P, CONV_NUM)

    # structural / numerical check: same kernel at HIGHEST matches tightly
    out_hi = edge_feature_attention(node, edge, mask, P,
                                    precision=lax.Precision.HIGHEST)
    out_hi = jax.block_until_ready(out_hi)
    np.testing.assert_allclose(np.asarray(out_hi), np.asarray(ref), atol=2e-3, rtol=2e-3)

    # fast-path sanity: only bf16 MXU rounding away from the f32 reference
    np.testing.assert_allclose(np.asarray(out), np.asarray(ref), atol=5e-2, rtol=5e-2)

    print("KERNEL_OK")
</pallas_src>

<mosaic_0001>
module attributes {stable_mosaic.version = 11 : i64} {
  func.func @kernel(%arg0: i32, %arg1: memref<8x8xf32, #tpu.memory_space<vmem>>, %arg2: memref<64x8xf32, #tpu.memory_space<vmem>>, %arg3: memref<8x8xf32, #tpu.memory_space<vmem>>, %arg4: memref<64x1xf32, #tpu.memory_space<vmem>>, %arg5: memref<208x64xf32, #tpu.memory_space<vmem>>, %arg6: memref<8x16x16xf32, #tpu.memory_space<vmem>>, %arg7: memref<8x16x16xf32, #tpu.memory_space<vmem>>, %arg8: memref<27xf32, #tpu.memory_space<smem>>, %arg9: memref<8x8xf32, #tpu.memory_space<vmem>>) attributes {dimension_semantics = [#tpu.dimension_semantics<parallel>], iteration_bounds = array<i64: 2>, scalar_prefetch = 0 : i64, scratch_operands = 0 : i64, tpu.core_type = #tpu.core_type<tc>, window_params = [{transform_indices = @transform_0, window_bounds = array<i64: 8, 8>}, {transform_indices = @transform_1, window_bounds = array<i64: 64, 8>}, {transform_indices = @transform_2, window_bounds = array<i64: 8, 8>}, {transform_indices = @transform_3, window_bounds = array<i64: 64, 1>}, {pipeline_mode = #tpu.pipeline_mode<synchronous>, transform_indices = @transform_4, window_bounds = array<i64: 208, 64>}, {pipeline_mode = #tpu.pipeline_mode<synchronous>, transform_indices = @transform_5, window_bounds = array<i64: 8, 16, 16>}, {pipeline_mode = #tpu.pipeline_mode<synchronous>, transform_indices = @transform_6, window_bounds = array<i64: 8, 16, 16>}, {transform_indices = @transform_7, window_bounds = array<i64: 27>}, {transform_indices = @transform_8, window_bounds = array<i64: 8, 8>}]} {
    %c0 = arith.constant 0 : index
    %c0_0 = arith.constant 0 : index
    %0 = vector.load %arg1[%c0, %c0_0] : memref<8x8xf32, #tpu.memory_space<vmem>>, vector<8x8xf32>
    %c0_1 = arith.constant 0 : index
    %c0_2 = arith.constant 0 : index
    %1 = vector.load %arg2[%c0_1, %c0_2] : memref<64x8xf32, #tpu.memory_space<vmem>>, vector<64x8xf32>
    %c0_3 = arith.constant 0 : index
    %c0_4 = arith.constant 0 : index
    %2 = vector.load %arg3[%c0_3, %c0_4] : memref<8x8xf32, #tpu.memory_space<vmem>>, vector<8x8xf32>
    %c0_5 = arith.constant 0 : index
    %c0_6 = arith.constant 0 : index
    %3 = vector.load %arg4[%c0_5, %c0_6] : memref<64x1xf32, #tpu.memory_space<vmem>>, vector<64x1xf32>
    %c0_7 = arith.constant 0 : index
    %c0_8 = arith.constant 0 : index
    %4 = vector.load %arg5[%c0_7, %c0_8] : memref<208x64xf32, #tpu.memory_space<vmem>>, vector<8x32xf32>
    %cst = arith.constant dense<0.000000e+00> : vector<8x32xf32>
    %5 = tpu.matmul %0, %4, %cst {dimension_numbers = #tpu.dot_dimension_numbers<[1], [0], [0], [1], [0, 0, 1, 1], [], []>} : vector<8x8xf32>, vector<8x32xf32>, vector<8x32xf32> -> vector<8x32xf32>
    %c8 = arith.constant 8 : index
    %c0_9 = arith.constant 0 : index
    %6 = vector.load %arg5[%c8, %c0_9] : memref<208x64xf32, #tpu.memory_space<vmem>>, vector<1x32xf32>
    %7 = vector.broadcast %6 : vector<1x32xf32> to vector<8x32xf32>
    %8 = arith.addf %5, %7 : vector<8x32xf32>
    %c16 = arith.constant 16 : index
    %c0_10 = arith.constant 0 : index
    %9 = vector.load %arg5[%c16, %c0_10] : memref<208x64xf32, #tpu.memory_space<vmem>>, vector<32x64xf32>
    %cst_11 = arith.constant dense<0.000000e+00> : vector<8x64xf32>
    %10 = tpu.matmul %8, %9, %cst_11 {dimension_numbers = #tpu.dot_dimension_numbers<[1], [0], [0], [1], [0, 0, 1, 1], [], []>} : vector<8x32xf32>, vector<32x64xf32>, vector<8x64xf32> -> vector<8x64xf32>
    %c48 = arith.constant 48 : index
    %c0_12 = arith.constant 0 : index
    %11 = vector.load %arg5[%c48, %c0_12] : memref<208x64xf32, #tpu.memory_space<vmem>>, vector<1x64xf32>
    %12 = vector.broadcast %11 : vector<1x64xf32> to vector<8x64xf32>
    %13 = arith.addf %10, %12 : vector<8x64xf32>
    %c56 = arith.constant 56 : index
    %c0_13 = arith.constant 0 : index
    %14 = vector.load %arg5[%c56, %c0_13] : memref<208x64xf32, #tpu.memory_space<vmem>>, vector<8x32xf32>
    %cst_14 = arith.constant dense<0.000000e+00> : vector<64x32xf32>
    %15 = tpu.matmul %1, %14, %cst_14 {dimension_numbers = #tpu.dot_dimension_numbers<[1], [0], [0], [1], [0, 0, 1, 1], [], []>} : vector<64x8xf32>, vector<8x32xf32>, vector<64x32xf32> -> vector<64x32xf32>
    %16 = vector.extract_strided_slice %13 {offsets = [0, 0], sizes = [8, 32], strides = [1, 1]} : vector<8x64xf32> to vector<8x32xf32>
    %17 = vector.extract_strided_slice %13 {offsets = [0, 32], sizes = [8, 32], strides = [1, 1]} : vector<8x64xf32> to vector<8x32xf32>
    %18 = vector.shape_cast %16 : vector<8x32xf32> to vector<8x1x32xf32>
    %19 = vector.shape_cast %18 : vector<8x1x32xf32> to vector<8x1x32xf32>
    %20 = vector.broadcast %19 : vector<8x1x32xf32> to vector<8x8x32xf32>
    %21 = vector.shape_cast %20 : vector<8x8x32xf32> to vector<64x32xf32>
    %22 = vector.shape_cast %17 : vector<8x32xf32> to vector<1x1x8x32xf32>
    %23 = vector.shape_cast %22 : vector<1x1x8x32xf32> to vector<1x1x8x32xf32>
    %24 = vector.broadcast %23 : vector<1x1x8x32xf32> to vector<1x8x8x32xf32>
    %25 = vector.shape_cast %24 : vector<1x8x8x32xf32> to vector<64x32xf32>
    %26 = arith.mulf %21, %25 : vector<64x32xf32>
    %27 = vector.broadcast %3 : vector<64x1xf32> to vector<64x32xf32>
    %28 = arith.mulf %26, %27 : vector<64x32xf32>
    %29 = tpu.concatenate %28, %15 in 1 : vector<64x32xf32>, vector<64x32xf32> -> vector<64x64xf32>
    %c64 = arith.constant 64 : index
    %c0_15 = arith.constant 0 : index
    %30 = vector.load %arg5[%c64, %c0_15] : memref<208x64xf32, #tpu.memory_space<vmem>>, vector<64x64xf32>
    %cst_16 = arith.constant dense<0.000000e+00> : vector<64x64xf32>
    %31 = tpu.matmul %29, %30, %cst_16 {dimension_numbers = #tpu.dot_dimension_numbers<[1], [0], [0], [1], [0, 0, 1, 1], [], []>} : vector<64x64xf32>, vector<64x64xf32>, vector<64x64xf32> -> vector<64x64xf32>
    %c0_17 = arith.constant 0 : index
    %32 = memref.load %arg8[%c0_17] : memref<27xf32, #tpu.memory_space<smem>>
    %cst_18 = arith.constant 0.000000e+00 : f32
    %33 = vector.broadcast %cst_18 : f32 to vector<64x64xf32>
    %34 = arith.cmpf oge, %31, %33 : vector<64x64xf32>
    %35 = vector.broadcast %32 : f32 to vector<64x64xf32>
    %36 = arith.mulf %31, %35 : vector<64x64xf32>
    %37 = arith.select %34, %31, %36 : vector<64x64xi1>, vector<64x64xf32>
    %38 = vector.shape_cast %37 : vector<64x64xf32> to vector<1x64x64xf32>
    %cst_19 = arith.constant dense<0xFF800000> : vector<1x64xf32>
    %39 = vector.multi_reduction <maximumf>, %38, %cst_19 [1] : vector<1x64x64xf32> to vector<1x64xf32>
    %cst_20 = arith.constant dense<0.000000e+00> : vector<1x64xf32>
    %40 = vector.multi_reduction <add>, %38, %cst_20 [1] : vector<1x64x64xf32> to vector<1x64xf32>
    %cst_21 = arith.constant 6.400000e+01 : f32
    %41 = vector.broadcast %cst_21 : f32 to vector<1x64xf32>
    %42 = arith.divf %40, %41 : vector<1x64xf32>
    %43 = tpu.concatenate %39, %42 in 0 : vector<1x64xf32>, vector<1x64xf32> -> vector<2x64xf32>
    %c128 = arith.constant 128 : index
    %c0_22 = arith.constant 0 : index
    %44 = vector.load %arg5[%c128, %c0_22] : memref<208x64xf32, #tpu.memory_space<vmem>>, vector<64x64xf32>
    %cst_23 = arith.constant dense<0.000000e+00> : vector<2x64xf32>
    %45 = tpu.matmul %43, %44, %cst_23 {dimension_numbers = #tpu.dot_dimension_numbers<[1], [0], [0], [1], [0, 0, 1, 1], [], []>} : vector<2x64xf32>, vector<64x64xf32>, vector<2x64xf32> -> vector<2x64xf32>
    %c192 = arith.constant 192 : index
    %c0_24 = arith.constant 0 : index
    %46 = vector.load %arg5[%c192, %c0_24] : memref<208x64xf32, #tpu.memory_space<vmem>>, vector<1x64xf32>
    %47 = vector.broadcast %46 : vector<1x64xf32> to vector<2x64xf32>
    %48 = arith.addf %45, %47 : vector<2x64xf32>
    %c1 = arith.constant 1 : index
    %49 = memref.load %arg8[%c1] : memref<27xf32, #tpu.memory_space<smem>>
    %cst_25 = arith.constant 0.000000e+00 : f32
    %50 = vector.broadcast %cst_25 : f32 to vector<2x64xf32>
    %51 = arith.cmpf oge, %48, %50 : vector<2x64xf32>
    %52 = vector.broadcast %49 : f32 to vector<2x64xf32>
    %53 = arith.mulf %48, %52 : vector<2x64xf32>
    %54 = arith.select %51, %48, %53 : vector<2x64xi1>, vector<2x64xf32>
    %55 = arith.addf %54, %43 : vector<2x64xf32>
    %56 = vector.extract_strided_slice %55 {offsets = [0, 0], sizes = [1, 64], strides = [1, 1]} : vector<2x64xf32> to vector<1x64xf32>
    %57 = vector.extract_strided_slice %55 {offsets = [1, 0], sizes = [1, 64], strides = [1, 1]} : vector<2x64xf32> to vector<1x64xf32>
    %58 = arith.addf %56, %57 : vector<1x64xf32>
    %59 = arith.negf %58 : vector<1x64xf32>
    %60 = math.exp %59 : vector<1x64xf32>
    %cst_26 = arith.constant 1.000000e+00 : f32
    %61 = vector.broadcast %cst_26 : f32 to vector<1x64xf32>
    %62 = arith.addf %61, %60 : vector<1x64xf32>
    %63 = arith.divf %61, %62 : vector<1x64xf32>
    %c200 = arith.constant 200 : index
    %c0_27 = arith.constant 0 : index
    %64 = vector.load %arg5[%c200, %c0_27] : memref<208x64xf32, #tpu.memory_space<vmem>>, vector<1x64xf32>
    %65 = vector.shape_cast %37 : vector<64x64xf32> to vector<1x8x8x64xf32>
    %66 = vector.shape_cast %64 : vector<1x64xf32> to vector<1x1x1x64xf32>
    %67 = vector.broadcast %66 : vector<1x1x1x64xf32> to vector<1x8x8x64xf32>
    %68 = arith.mulf %65, %67 : vector<1x8x8x64xf32>
    %cst_28 = arith.constant dense<0.000000e+00> : vector<1x8x8xf32>
    %69 = vector.multi_reduction <add>, %65, %cst_28 [3] : vector<1x8x8x64xf32> to vector<1x8x8xf32>
    %cst_29 = arith.constant 6.400000e+01 : f32
    %70 = vector.broadcast %cst_29 : f32 to vector<1x8x8xf32>
    %71 = arith.divf %69, %70 : vector<1x8x8xf32>
    %72 = vector.shape_cast %71 : vector<1x8x8xf32> to vector<8x8xf32>
    %cst_30 = arith.constant dense<0xFF800000> : vector<1x8x8xf32>
    %73 = vector.multi_reduction <maximumf>, %65, %cst_30 [3] : vector<1x8x8x64xf32> to vector<1x8x8xf32>
    %74 = vector.shape_cast %73 : vector<1x8x8xf32> to vector<8x8xf32>
    %cst_31 = arith.constant dense<0.000000e+00> : vector<1x8x8xf32>
    %75 = vector.multi_reduction <add>, %68, %cst_31 [3] : vector<1x8x8x64xf32> to vector<1x8x8xf32>
    %76 = vector.shape_cast %75 : vector<1x8x8xf32> to vector<8x8xf32>
    %77 = vector.shape_cast %63 : vector<1x64xf32> to vector<1x1x1x64xf32>
    %78 = vector.broadcast %77 : vector<1x1x1x64xf32> to vector<1x8x8x64xf32>
    %79 = arith.mulf %68, %78 : vector<1x8x8x64xf32>
    %cst_32 = arith.constant dense<0.000000e+00> : vector<1x8x8xf32>
    %80 = vector.multi_reduction <add>, %79, %cst_32 [3] : vector<1x8x8x64xf32> to vector<1x8x8xf32>
    %81 = vector.shape_cast %80 : vector<1x8x8xf32> to vector<8x8xf32>
    %82 = tpu.concatenate %72, %74 in 0 : vector<8x8xf32>, vector<8x8xf32> -> vector<16x8xf32>
    %83 = tpu.concatenate %72, %74 in 1 : vector<8x8xf32>, vector<8x8xf32> -> vector<8x16xf32>
    %c0_33 = arith.constant 0 : index
    %c0_34 = arith.constant 0 : index
    %c0_35 = arith.constant 0 : index
    %84 = vector.load %arg6[%c0_33, %c0_34, %c0_35] : memref<8x16x16xf32, #tpu.memory_space<vmem>>, vector<1x16x16xf32>
    %85 = vector.shape_cast %84 : vector<1x16x16xf32> to vector<16x16xf32>
    %cst_36 = arith.constant dense<0.000000e+00> : vector<16x8xf32>
    %86 = tpu.matmul %85, %82, %cst_36 {dimension_numbers = #tpu.dot_dimension_numbers<[1], [0], [0], [1], [0, 0, 1, 1], [], []>} : vector<16x16xf32>, vector<16x8xf32>, vector<16x8xf32> -> vector<16x8xf32>
    %c0_37 = arith.constant 0 : index
    %c0_38 = arith.constant 0 : index
    %c0_39 = arith.constant 0 : index
    %87 = vector.load %arg7[%c0_37, %c0_38, %c0_39] : memref<8x16x16xf32, #tpu.memory_space<vmem>>, vector<1x16x16xf32>
    %88 = vector.shape_cast %87 : vector<1x16x16xf32> to vector<16x16xf32>
    %cst_40 = arith.constant dense<0.000000e+00> : vector<8x16xf32>
    %89 = tpu.matmul %83, %88, %cst_40 {dimension_numbers = #tpu.dot_dimension_numbers<[1], [0], [0], [1], [0, 0, 1, 1], [], []>} : vector<8x16xf32>, vector<16x16xf32>, vector<8x16xf32> -> vector<8x16xf32>
    %c2 = arith.constant 2 : index
    %90 = memref.load %arg8[%c2] : memref<27xf32, #tpu.memory_space<smem>>
    %91 = vector.extract_strided_slice %86 {offsets = [0, 0], sizes = [8, 8], strides = [1, 1]} : vector<16x8xf32> to vector<8x8xf32>
    %92 = vector.extract_strided_slice %89 {offsets = [0, 0], sizes = [8, 8], strides = [1, 1]} : vector<8x16xf32> to vector<8x8xf32>
    %93 = arith.addf %91, %92 : vector<8x8xf32>
    %c9 = arith.constant 9 : index
    %94 = memref.load %arg8[%c9] : memref<27xf32, #tpu.memory_space<smem>>
    %95 = vector.broadcast %94 : f32 to vector<8x8xf32>
    %96 = arith.addf %93, %95 : vector<8x8xf32>
    %97 = vector.extract_strided_slice %86 {offsets = [8, 0], sizes = [8, 8], strides = [1, 1]} : vector<16x8xf32> to vector<8x8xf32>
    %98 = vector.extract_strided_slice %89 {offsets = [0, 8], sizes = [8, 8], strides = [1, 1]} : vector<8x16xf32> to vector<8x8xf32>
    %99 = arith.addf %97, %98 : vector<8x8xf32>
    %c10 = arith.constant 10 : index
    %100 = memref.load %arg8[%c10] : memref<27xf32, #tpu.memory_space<smem>>
    %101 = vector.broadcast %100 : f32 to vector<8x8xf32>
    %102 = arith.addf %99, %101 : vector<8x8xf32>
    %cst_41 = arith.constant 0.000000e+00 : f32
    %103 = vector.broadcast %cst_41 : f32 to vector<8x8xf32>
    %104 = arith.cmpf oge, %96, %103 : vector<8x8xf32>
    %105 = vector.broadcast %90 : f32 to vector<8x8xf32>
    %106 = arith.mulf %96, %105 : vector<8x8xf32>
    %107 = arith.select %104, %96, %106 : vector<8x8xi1>, vector<8x8xf32>
    %108 = arith.mulf %107, %2 : vector<8x8xf32>
    %109 = arith.addf %108, %72 : vector<8x8xf32>
    %cst_42 = arith.constant 0.000000e+00 : f32
    %110 = vector.broadcast %cst_42 : f32 to vector<8x8xf32>
    %111 = arith.cmpf oge, %102, %110 : vector<8x8xf32>
    %112 = vector.broadcast %90 : f32 to vector<8x8xf32>
    %113 = arith.mulf %102, %112 : vector<8x8xf32>
    %114 = arith.select %111, %102, %113 : vector<8x8xi1>, vector<8x8xf32>
    %115 = arith.mulf %114, %2 : vector<8x8xf32>
    %116 = arith.addf %115, %74 : vector<8x8xf32>
    %117 = tpu.concatenate %109, %116 in 0 : vector<8x8xf32>, vector<8x8xf32> -> vector<16x8xf32>
    %118 = tpu.concatenate %109, %116 in 1 : vector<8x8xf32>, vector<8x8xf32> -> vector<8x16xf32>
    %c1_43 = arith.constant 1 : index
    %c0_44 = arith.constant 0 : index
    %c0_45 = arith.constant 0 : index
    %119 = vector.load %arg6[%c1_43, %c0_44, %c0_45] : memref<8x16x16xf32, #tpu.memory_space<vmem>>, vector<1x16x16xf32>
    %120 = vector.shape_cast %119 : vector<1x16x16xf32> to vector<16x16xf32>
    %cst_46 = arith.constant dense<0.000000e+00> : vector<16x8xf32>
    %121 = tpu.matmul %120, %117, %cst_46 {dimension_numbers = #tpu.dot_dimension_numbers<[1], [0], [0], [1], [0, 0, 1, 1], [], []>} : vector<16x16xf32>, vector<16x8xf32>, vector<16x8xf32> -> vector<16x8xf32>
    %c1_47 = arith.constant 1 : index
    %c0_48 = arith.constant 0 : index
    %c0_49 = arith.constant 0 : index
    %122 = vector.load %arg7[%c1_47, %c0_48, %c0_49] : memref<8x16x16xf32, #tpu.memory_space<vmem>>, vector<1x16x16xf32>
    %123 = vector.shape_cast %122 : vector<1x16x16xf32> to vector<16x16xf32>
    %cst_50 = arith.constant dense<0.000000e+00> : vector<8x16xf32>
    %124 = tpu.matmul %118, %123, %cst_50 {dimension_numbers = #tpu.dot_dimension_numbers<[1], [0], [0], [1], [0, 0, 1, 1], [], []>} : vector<8x16xf32>, vector<16x16xf32>, vector<8x16xf32> -> vector<8x16xf32>
    %c3 = arith.constant 3 : index
    %125 = memref.load %arg8[%c3] : memref<27xf32, #tpu.memory_space<smem>>
    %126 = vector.extract_strided_slice %121 {offsets = [0, 0], sizes = [8, 8], strides = [1, 1]} : vector<16x8xf32> to vector<8x8xf32>
    %127 = vector.extract_strided_slice %124 {offsets = [0, 0], sizes = [8, 8], strides = [1, 1]} : vector<8x16xf32> to vector<8x8xf32>
    %128 = arith.addf %126, %127 : vector<8x8xf32>
    %c11 = arith.constant 11 : index
    %129 = memref.load %arg8[%c11] : memref<27xf32, #tpu.memory_space<smem>>
    %130 = vector.broadcast %129 : f32 to vector<8x8xf32>
    %131 = arith.addf %128, %130 : vector<8x8xf32>
    %132 = vector.extract_strided_slice %121 {offsets = [8, 0], sizes = [8, 8], strides = [1, 1]} : vector<16x8xf32> to vector<8x8xf32>
    %133 = vector.extract_strided_slice %124 {offsets = [0, 8], sizes = [8, 8], strides = [1, 1]} : vector<8x16xf32> to vector<8x8xf32>
    %134 = arith.addf %132, %133 : vector<8x8xf32>
    %c12 = arith.constant 12 : index
    %135 = memref.load %arg8[%c12] : memref<27xf32, #tpu.memory_space<smem>>
    %136 = vector.broadcast %135 : f32 to vector<8x8xf32>
    %137 = arith.addf %134, %136 : vector<8x8xf32>
    %cst_51 = arith.constant 0.000000e+00 : f32
    %138 = vector.broadcast %cst_51 : f32 to vector<8x8xf32>
    %139 = arith.cmpf oge, %131, %138 : vector<8x8xf32>
    %140 = vector.broadcast %125 : f32 to vector<8x8xf32>
    %141 = arith.mulf %131, %140 : vector<8x8xf32>
    %142 = arith.select %139, %131, %141 : vector<8x8xi1>, vector<8x8xf32>
    %143 = arith.mulf %142, %2 : vector<8x8xf32>
    %144 = arith.addf %143, %109 : vector<8x8xf32>
    %cst_52 = arith.constant 0.000000e+00 : f32
    %145 = vector.broadcast %cst_52 : f32 to vector<8x8xf32>
    %146 = arith.cmpf oge, %137, %145 : vector<8x8xf32>
    %147 = vector.broadcast %125 : f32 to vector<8x8xf32>
    %148 = arith.mulf %137, %147 : vector<8x8xf32>
    %149 = arith.select %146, %137, %148 : vector<8x8xi1>, vector<8x8xf32>
    %150 = arith.mulf %149, %2 : vector<8x8xf32>
    %151 = arith.addf %150, %116 : vector<8x8xf32>
    %152 = tpu.concatenate %144, %151 in 0 : vector<8x8xf32>, vector<8x8xf32> -> vector<16x8xf32>
    %153 = tpu.concatenate %144, %151 in 1 : vector<8x8xf32>, vector<8x8xf32> -> vector<8x16xf32>
    %c2_53 = arith.constant 2 : index
    %c0_54 = arith.constant 0 : index
    %c0_55 = arith.constant 0 : index
    %154 = vector.load %arg6[%c2_53, %c0_54, %c0_55] : memref<8x16x16xf32, #tpu.memory_space<vmem>>, vector<1x16x16xf32>
    %155 = vector.shape_cast %154 : vector<1x16x16xf32> to vector<16x16xf32>
    %cst_56 = arith.constant dense<0.000000e+00> : vector<16x8xf32>
    %156 = tpu.matmul %155, %152, %cst_56 {dimension_numbers = #tpu.dot_dimension_numbers<[1], [0], [0], [1], [0, 0, 1, 1], [], []>} : vector<16x16xf32>, vector<16x8xf32>, vector<16x8xf32> -> vector<16x8xf32>
    %c2_57 = arith.constant 2 : index
    %c0_58 = arith.constant 0 : index
    %c0_59 = arith.constant 0 : index
    %157 = vector.load %arg7[%c2_57, %c0_58, %c0_59] : memref<8x16x16xf32, #tpu.memory_space<vmem>>, vector<1x16x16xf32>
    %158 = vector.shape_cast %157 : vector<1x16x16xf32> to vector<16x16xf32>
    %cst_60 = arith.constant dense<0.000000e+00> : vector<8x16xf32>
    %159 = tpu.matmul %153, %158, %cst_60 {dimension_numbers = #tpu.dot_dimension_numbers<[1], [0], [0], [1], [0, 0, 1, 1], [], []>} : vector<8x16xf32>, vector<16x16xf32>, vector<8x16xf32> -> vector<8x16xf32>
    %c4 = arith.constant 4 : index
    %160 = memref.load %arg8[%c4] : memref<27xf32, #tpu.memory_space<smem>>
    %161 = vector.extract_strided_slice %156 {offsets = [0, 0], sizes = [8, 8], strides = [1, 1]} : vector<16x8xf32> to vector<8x8xf32>
    %162 = vector.extract_strided_slice %159 {offsets = [0, 0], sizes = [8, 8], strides = [1, 1]} : vector<8x16xf32> to vector<8x8xf32>
    %163 = arith.addf %161, %162 : vector<8x8xf32>
    %c13 = arith.constant 13 : index
    %164 = memref.load %arg8[%c13] : memref<27xf32, #tpu.memory_space<smem>>
    %165 = vector.broadcast %164 : f32 to vector<8x8xf32>
    %166 = arith.addf %163, %165 : vector<8x8xf32>
    %167 = vector.extract_strided_slice %156 {offsets = [8, 0], sizes = [8, 8], strides = [1, 1]} : vector<16x8xf32> to vector<8x8xf32>
    %168 = vector.extract_strided_slice %159 {offsets = [0, 8], sizes = [8, 8], strides = [1, 1]} : vector<8x16xf32> to vector<8x8xf32>
    %169 = arith.addf %167, %168 : vector<8x8xf32>
    %c14 = arith.constant 14 : index
    %170 = memref.load %arg8[%c14] : memref<27xf32, #tpu.memory_space<smem>>
    %171 = vector.broadcast %170 : f32 to vector<8x8xf32>
    %172 = arith.addf %169, %171 : vector<8x8xf32>
    %cst_61 = arith.constant 0.000000e+00 : f32
    %173 = vector.broadcast %cst_61 : f32 to vector<8x8xf32>
    %174 = arith.cmpf oge, %166, %173 : vector<8x8xf32>
    %175 = vector.broadcast %160 : f32 to vector<8x8xf32>
    %176 = arith.mulf %166, %175 : vector<8x8xf32>
    %177 = arith.select %174, %166, %176 : vector<8x8xi1>, vector<8x8xf32>
    %178 = arith.mulf %177, %2 : vector<8x8xf32>
    %179 = arith.addf %178, %144 : vector<8x8xf32>
    %cst_62 = arith.constant 0.000000e+00 : f32
    %180 = vector.broadcast %cst_62 : f32 to vector<8x8xf32>
    %181 = arith.cmpf oge, %172, %180 : vector<8x8xf32>
    %182 = vector.broadcast %160 : f32 to vector<8x8xf32>
    %183 = arith.mulf %172, %182 : vector<8x8xf32>
    %184 = arith.select %181, %172, %183 : vector<8x8xi1>, vector<8x8xf32>
    %185 = arith.mulf %184, %2 : vector<8x8xf32>
    %186 = arith.addf %185, %151 : vector<8x8xf32>
    %187 = tpu.concatenate %179, %186 in 0 : vector<8x8xf32>, vector<8x8xf32> -> vector<16x8xf32>
    %188 = tpu.concatenate %179, %186 in 1 : vector<8x8xf32>, vector<8x8xf32> -> vector<8x16xf32>
    %c3_63 = arith.constant 3 : index
    %c0_64 = arith.constant 0 : index
    %c0_65 = arith.constant 0 : index
    %189 = vector.load %arg6[%c3_63, %c0_64, %c0_65] : memref<8x16x16xf32, #tpu.memory_space<vmem>>, vector<1x16x16xf32>
    %190 = vector.shape_cast %189 : vector<1x16x16xf32> to vector<16x16xf32>
    %cst_66 = arith.constant dense<0.000000e+00> : vector<16x8xf32>
    %191 = tpu.matmul %190, %187, %cst_66 {dimension_numbers = #tpu.dot_dimension_numbers<[1], [0], [0], [1], [0, 0, 1, 1], [], []>} : vector<16x16xf32>, vector<16x8xf32>, vector<16x8xf32> -> vector<16x8xf32>
    %c3_67 = arith.constant 3 : index
    %c0_68 = arith.constant 0 : index
    %c0_69 = arith.constant 0 : index
    %192 = vector.load %arg7[%c3_67, %c0_68, %c0_69] : memref<8x16x16xf32, #tpu.memory_space<vmem>>, vector<1x16x16xf32>
    %193 = vector.shape_cast %192 : vector<1x16x16xf32> to vector<16x16xf32>
    %cst_70 = arith.constant dense<0.000000e+00> : vector<8x16xf32>
    %194 = tpu.matmul %188, %193, %cst_70 {dimension_numbers = #tpu.dot_dimension_numbers<[1], [0], [0], [1], [0, 0, 1, 1], [], []>} : vector<8x16xf32>, vector<16x16xf32>, vector<8x16xf32> -> vector<8x16xf32>
    %c5 = arith.constant 5 : index
    %195 = memref.load %arg8[%c5] : memref<27xf32, #tpu.memory_space<smem>>
    %196 = vector.extract_strided_slice %191 {offsets = [0, 0], sizes = [8, 8], strides = [1, 1]} : vector<16x8xf32> to vector<8x8xf32>
    %197 = vector.extract_strided_slice %194 {offsets = [0, 0], sizes = [8, 8], strides = [1, 1]} : vector<8x16xf32> to vector<8x8xf32>
    %198 = arith.addf %196, %197 : vector<8x8xf32>
    %c15 = arith.constant 15 : index
    %199 = memref.load %arg8[%c15] : memref<27xf32, #tpu.memory_space<smem>>
    %200 = vector.broadcast %199 : f32 to vector<8x8xf32>
    %201 = arith.addf %198, %200 : vector<8x8xf32>
    %202 = vector.extract_strided_slice %191 {offsets = [8, 0], sizes = [8, 8], strides = [1, 1]} : vector<16x8xf32> to vector<8x8xf32>
    %203 = vector.extract_strided_slice %194 {offsets = [0, 8], sizes = [8, 8], strides = [1, 1]} : vector<8x16xf32> to vector<8x8xf32>
    %204 = arith.addf %202, %203 : vector<8x8xf32>
    %c16_71 = arith.constant 16 : index
    %205 = memref.load %arg8[%c16_71] : memref<27xf32, #tpu.memory_space<smem>>
    %206 = vector.broadcast %205 : f32 to vector<8x8xf32>
    %207 = arith.addf %204, %206 : vector<8x8xf32>
    %cst_72 = arith.constant 0.000000e+00 : f32
    %208 = vector.broadcast %cst_72 : f32 to vector<8x8xf32>
    %209 = arith.cmpf oge, %201, %208 : vector<8x8xf32>
    %210 = vector.broadcast %195 : f32 to vector<8x8xf32>
    %211 = arith.mulf %201, %210 : vector<8x8xf32>
    %212 = arith.select %209, %201, %211 : vector<8x8xi1>, vector<8x8xf32>
    %213 = arith.mulf %212, %2 : vector<8x8xf32>
    %214 = arith.addf %213, %179 : vector<8x8xf32>
    %cst_73 = arith.constant 0.000000e+00 : f32
    %215 = vector.broadcast %cst_73 : f32 to vector<8x8xf32>
    %216 = arith.cmpf oge, %207, %215 : vector<8x8xf32>
    %217 = vector.broadcast %195 : f32 to vector<8x8xf32>
    %218 = arith.mulf %207, %217 : vector<8x8xf32>
    %219 = arith.select %216, %207, %218 : vector<8x8xi1>, vector<8x8xf32>
    %220 = arith.mulf %219, %2 : vector<8x8xf32>
    %221 = arith.addf %220, %186 : vector<8x8xf32>
    %222 = tpu.concatenate %214, %221 in 0 : vector<8x8xf32>, vector<8x8xf32> -> vector<16x8xf32>
    %223 = tpu.concatenate %214, %221 in 1 : vector<8x8xf32>, vector<8x8xf32> -> vector<8x16xf32>
    %c4_74 = arith.constant 4 : index
    %c0_75 = arith.constant 0 : index
    %c0_76 = arith.constant 0 : index
    %224 = vector.load %arg6[%c4_74, %c0_75, %c0_76] : memref<8x16x16xf32, #tpu.memory_space<vmem>>, vector<1x16x16xf32>
    %225 = vector.shape_cast %224 : vector<1x16x16xf32> to vector<16x16xf32>
    %cst_77 = arith.constant dense<0.000000e+00> : vector<16x8xf32>
    %226 = tpu.matmul %225, %222, %cst_77 {dimension_numbers = #tpu.dot_dimension_numbers<[1], [0], [0], [1], [0, 0, 1, 1], [], []>} : vector<16x16xf32>, vector<16x8xf32>, vector<16x8xf32> -> vector<16x8xf32>
    %c4_78 = arith.constant 4 : index
    %c0_79 = arith.constant 0 : index
    %c0_80 = arith.constant 0 : index
    %227 = vector.load %arg7[%c4_78, %c0_79, %c0_80] : memref<8x16x16xf32, #tpu.memory_space<vmem>>, vector<1x16x16xf32>
    %228 = vector.shape_cast %227 : vector<1x16x16xf32> to vector<16x16xf32>
    %cst_81 = arith.constant dense<0.000000e+00> : vector<8x16xf32>
    %229 = tpu.matmul %223, %228, %cst_81 {dimension_numbers = #tpu.dot_dimension_numbers<[1], [0], [0], [1], [0, 0, 1, 1], [], []>} : vector<8x16xf32>, vector<16x16xf32>, vector<8x16xf32> -> vector<8x16xf32>
    %c6 = arith.constant 6 : index
    %230 = memref.load %arg8[%c6] : memref<27xf32, #tpu.memory_space<smem>>
    %231 = vector.extract_strided_slice %226 {offsets = [0, 0], sizes = [8, 8], strides = [1, 1]} : vector<16x8xf32> to vector<8x8xf32>
    %232 = vector.extract_strided_slice %229 {offsets = [0, 0], sizes = [8, 8], strides = [1, 1]} : vector<8x16xf32> to vector<8x8xf32>
    %233 = arith.addf %231, %232 : vector<8x8xf32>
    %c17 = arith.constant 17 : index
    %234 = memref.load %arg8[%c17] : memref<27xf32, #tpu.memory_space<smem>>
    %235 = vector.broadcast %234 : f32 to vector<8x8xf32>
    %236 = arith.addf %233, %235 : vector<8x8xf32>
    %237 = vector.extract_strided_slice %226 {offsets = [8, 0], sizes = [8, 8], strides = [1, 1]} : vector<16x8xf32> to vector<8x8xf32>
    %238 = vector.extract_strided_slice %229 {offsets = [0, 8], sizes = [8, 8], strides = [1, 1]} : vector<8x16xf32> to vector<8x8xf32>
    %239 = arith.addf %237, %238 : vector<8x8xf32>
    %c18 = arith.constant 18 : index
    %240 = memref.load %arg8[%c18] : memref<27xf32, #tpu.memory_space<smem>>
    %241 = vector.broadcast %240 : f32 to vector<8x8xf32>
    %242 = arith.addf %239, %241 : vector<8x8xf32>
    %cst_82 = arith.constant 0.000000e+00 : f32
    %243 = vector.broadcast %cst_82 : f32 to vector<8x8xf32>
    %244 = arith.cmpf oge, %236, %243 : vector<8x8xf32>
    %245 = vector.broadcast %230 : f32 to vector<8x8xf32>
    %246 = arith.mulf %236, %245 : vector<8x8xf32>
    %247 = arith.select %244, %236, %246 : vector<8x8xi1>, vector<8x8xf32>
    %248 = arith.mulf %247, %2 : vector<8x8xf32>
    %249 = arith.addf %248, %214 : vector<8x8xf32>
    %cst_83 = arith.constant 0.000000e+00 : f32
    %250 = vector.broadcast %cst_83 : f32 to vector<8x8xf32>
    %251 = arith.cmpf oge, %242, %250 : vector<8x8xf32>
    %252 = vector.broadcast %230 : f32 to vector<8x8xf32>
    %253 = arith.mulf %242, %252 : vector<8x8xf32>
    %254 = arith.select %251, %242, %253 : vector<8x8xi1>, vector<8x8xf32>
    %255 = arith.mulf %254, %2 : vector<8x8xf32>
    %256 = arith.addf %255, %221 : vector<8x8xf32>
    %257 = tpu.concatenate %249, %256 in 0 : vector<8x8xf32>, vector<8x8xf32> -> vector<16x8xf32>
    %258 = tpu.concatenate %249, %256 in 1 : vector<8x8xf32>, vector<8x8xf32> -> vector<8x16xf32>
    %c5_84 = arith.constant 5 : index
    %c0_85 = arith.constant 0 : index
    %c0_86 = arith.constant 0 : index
    %259 = vector.load %arg6[%c5_84, %c0_85, %c0_86] : memref<8x16x16xf32, #tpu.memory_space<vmem>>, vector<1x16x16xf32>
    %260 = vector.shape_cast %259 : vector<1x16x16xf32> to vector<16x16xf32>
    %cst_87 = arith.constant dense<0.000000e+00> : vector<16x8xf32>
    %261 = tpu.matmul %260, %257, %cst_87 {dimension_numbers = #tpu.dot_dimension_numbers<[1], [0], [0], [1], [0, 0, 1, 1], [], []>} : vector<16x16xf32>, vector<16x8xf32>, vector<16x8xf32> -> vector<16x8xf32>
    %c5_88 = arith.constant 5 : index
    %c0_89 = arith.constant 0 : index
    %c0_90 = arith.constant 0 : index
    %262 = vector.load %arg7[%c5_88, %c0_89, %c0_90] : memref<8x16x16xf32, #tpu.memory_space<vmem>>, vector<1x16x16xf32>
    %263 = vector.shape_cast %262 : vector<1x16x16xf32> to vector<16x16xf32>
    %cst_91 = arith.constant dense<0.000000e+00> : vector<8x16xf32>
    %264 = tpu.matmul %258, %263, %cst_91 {dimension_numbers = #tpu.dot_dimension_numbers<[1], [0], [0], [1], [0, 0, 1, 1], [], []>} : vector<8x16xf32>, vector<16x16xf32>, vector<8x16xf32> -> vector<8x16xf32>
    %c7 = arith.constant 7 : index
    %265 = memref.load %arg8[%c7] : memref<27xf32, #tpu.memory_space<smem>>
    %266 = vector.extract_strided_slice %261 {offsets = [0, 0], sizes = [8, 8], strides = [1, 1]} : vector<16x8xf32> to vector<8x8xf32>
    %267 = vector.extract_strided_slice %264 {offsets = [0, 0], sizes = [8, 8], strides = [1, 1]} : vector<8x16xf32> to vector<8x8xf32>
    %268 = arith.addf %266, %267 : vector<8x8xf32>
    %c19 = arith.constant 19 : index
    %269 = memref.load %arg8[%c19] : memref<27xf32, #tpu.memory_space<smem>>
    %270 = vector.broadcast %269 : f32 to vector<8x8xf32>
    %271 = arith.addf %268, %270 : vector<8x8xf32>
    %272 = vector.extract_strided_slice %261 {offsets = [8, 0], sizes = [8, 8], strides = [1, 1]} : vector<16x8xf32> to vector<8x8xf32>
    %273 = vector.extract_strided_slice %264 {offsets = [0, 8], sizes = [8, 8], strides = [1, 1]} : vector<8x16xf32> to vector<8x8xf32>
    %274 = arith.addf %272, %273 : vector<8x8xf32>
    %c20 = arith.constant 20 : index
    %275 = memref.load %arg8[%c20] : memref<27xf32, #tpu.memory_space<smem>>
    %276 = vector.broadcast %275 : f32 to vector<8x8xf32>
    %277 = arith.addf %274, %276 : vector<8x8xf32>
    %cst_92 = arith.constant 0.000000e+00 : f32
    %278 = vector.broadcast %cst_92 : f32 to vector<8x8xf32>
    %279 = arith.cmpf oge, %271, %278 : vector<8x8xf32>
    %280 = vector.broadcast %265 : f32 to vector<8x8xf32>
    %281 = arith.mulf %271, %280 : vector<8x8xf32>
    %282 = arith.select %279, %271, %281 : vector<8x8xi1>, vector<8x8xf32>
    %283 = arith.mulf %282, %2 : vector<8x8xf32>
    %284 = arith.addf %283, %249 : vector<8x8xf32>
    %cst_93 = arith.constant 0.000000e+00 : f32
    %285 = vector.broadcast %cst_93 : f32 to vector<8x8xf32>
    %286 = arith.cmpf oge, %277, %285 : vector<8x8xf32>
    %287 = vector.broadcast %265 : f32 to vector<8x8xf32>
    %288 = arith.mulf %277, %287 : vector<8x8xf32>
    %289 = arith.select %286, %277, %288 : vector<8x8xi1>, vector<8x8xf32>
    %290 = arith.mulf %289, %2 : vector<8x8xf32>
    %291 = arith.addf %290, %256 : vector<8x8xf32>
    %292 = tpu.concatenate %284, %291 in 0 : vector<8x8xf32>, vector<8x8xf32> -> vector<16x8xf32>
    %293 = tpu.concatenate %284, %291 in 1 : vector<8x8xf32>, vector<8x8xf32> -> vector<8x16xf32>
    %c6_94 = arith.constant 6 : index
    %c0_95 = arith.constant 0 : index
    %c0_96 = arith.constant 0 : index
    %294 = vector.load %arg6[%c6_94, %c0_95, %c0_96] : memref<8x16x16xf32, #tpu.memory_space<vmem>>, vector<1x16x16xf32>
    %295 = vector.shape_cast %294 : vector<1x16x16xf32> to vector<16x16xf32>
    %cst_97 = arith.constant dense<0.000000e+00> : vector<16x8xf32>
    %296 = tpu.matmul %295, %292, %cst_97 {dimension_numbers = #tpu.dot_dimension_numbers<[1], [0], [0], [1], [0, 0, 1, 1], [], []>} : vector<16x16xf32>, vector<16x8xf32>, vector<16x8xf32> -> vector<16x8xf32>
    %c6_98 = arith.constant 6 : index
    %c0_99 = arith.constant 0 : index
    %c0_100 = arith.constant 0 : index
    %297 = vector.load %arg7[%c6_98, %c0_99, %c0_100] : memref<8x16x16xf32, #tpu.memory_space<vmem>>, vector<1x16x16xf32>
    %298 = vector.shape_cast %297 : vector<1x16x16xf32> to vector<16x16xf32>
    %cst_101 = arith.constant dense<0.000000e+00> : vector<8x16xf32>
    %299 = tpu.matmul %293, %298, %cst_101 {dimension_numbers = #tpu.dot_dimension_numbers<[1], [0], [0], [1], [0, 0, 1, 1], [], []>} : vector<8x16xf32>, vector<16x16xf32>, vector<8x16xf32> -> vector<8x16xf32>
    %c8_102 = arith.constant 8 : index
    %300 = memref.load %arg8[%c8_102] : memref<27xf32, #tpu.memory_space<smem>>
    %301 = vector.extract_strided_slice %296 {offsets = [0, 0], sizes = [8, 8], strides = [1, 1]} : vector<16x8xf32> to vector<8x8xf32>
    %302 = vector.extract_strided_slice %299 {offsets = [0, 0], sizes = [8, 8], strides = [1, 1]} : vector<8x16xf32> to vector<8x8xf32>
    %303 = arith.addf %301, %302 : vector<8x8xf32>
    %c21 = arith.constant 21 : index
    %304 = memref.load %arg8[%c21] : memref<27xf32, #tpu.memory_space<smem>>
    %305 = vector.broadcast %304 : f32 to vector<8x8xf32>
    %306 = arith.addf %303, %305 : vector<8x8xf32>
    %307 = vector.extract_strided_slice %296 {offsets = [8, 0], sizes = [8, 8], strides = [1, 1]} : vector<16x8xf32> to vector<8x8xf32>
    %308 = vector.extract_strided_slice %299 {offsets = [0, 8], sizes = [8, 8], strides = [1, 1]} : vector<8x16xf32> to vector<8x8xf32>
    %309 = arith.addf %307, %308 : vector<8x8xf32>
    %c22 = arith.constant 22 : index
    %310 = memref.load %arg8[%c22] : memref<27xf32, #tpu.memory_space<smem>>
    %311 = vector.broadcast %310 : f32 to vector<8x8xf32>
    %312 = arith.addf %309, %311 : vector<8x8xf32>
    %cst_103 = arith.constant 0.000000e+00 : f32
    %313 = vector.broadcast %cst_103 : f32 to vector<8x8xf32>
    %314 = arith.cmpf oge, %306, %313 : vector<8x8xf32>
    %315 = vector.broadcast %300 : f32 to vector<8x8xf32>
    %316 = arith.mulf %306, %315 : vector<8x8xf32>
    %317 = arith.select %314, %306, %316 : vector<8x8xi1>, vector<8x8xf32>
    %318 = arith.mulf %317, %2 : vector<8x8xf32>
    %319 = arith.addf %318, %284 : vector<8x8xf32>
    %cst_104 = arith.constant 0.000000e+00 : f32
    %320 = vector.broadcast %cst_104 : f32 to vector<8x8xf32>
    %321 = arith.cmpf oge, %312, %320 : vector<8x8xf32>
    %322 = vector.broadcast %300 : f32 to vector<8x8xf32>
    %323 = arith.mulf %312, %322 : vector<8x8xf32>
    %324 = arith.select %321, %312, %323 : vector<8x8xi1>, vector<8x8xf32>
    %325 = arith.mulf %324, %2 : vector<8x8xf32>
    %326 = arith.addf %325, %291 : vector<8x8xf32>
    %327 = tpu.concatenate %319, %326 in 0 : vector<8x8xf32>, vector<8x8xf32> -> vector<16x8xf32>
    %328 = tpu.concatenate %319, %326 in 1 : vector<8x8xf32>, vector<8x8xf32> -> vector<8x16xf32>
    %c7_105 = arith.constant 7 : index
    %c0_106 = arith.constant 0 : index
    %c0_107 = arith.constant 0 : index
    %329 = vector.load %arg6[%c7_105, %c0_106, %c0_107] : memref<8x16x16xf32, #tpu.memory_space<vmem>>, vector<1x16x16xf32>
    %330 = vector.shape_cast %329 : vector<1x16x16xf32> to vector<16x16xf32>
    %cst_108 = arith.constant dense<0.000000e+00> : vector<16x8xf32>
    %331 = tpu.matmul %330, %327, %cst_108 {dimension_numbers = #tpu.dot_dimension_numbers<[1], [0], [0], [1], [0, 0, 1, 1], [], []>} : vector<16x16xf32>, vector<16x8xf32>, vector<16x8xf32> -> vector<16x8xf32>
    %332 = vector.extract_strided_slice %331 {offsets = [0, 0], sizes = [8, 8], strides = [1, 1]} : vector<16x8xf32> to vector<8x8xf32>
    %c7_109 = arith.constant 7 : index
    %c0_110 = arith.constant 0 : index
    %c0_111 = arith.constant 0 : index
    %333 = vector.load %arg7[%c7_109, %c0_110, %c0_111] : memref<8x16x16xf32, #tpu.memory_space<vmem>>, vector<1x16x16xf32>
    %334 = vector.shape_cast %333 : vector<1x16x16xf32> to vector<16x16xf32>
    %cst_112 = arith.constant dense<0.000000e+00> : vector<8x16xf32>
    %335 = tpu.matmul %328, %334, %cst_112 {dimension_numbers = #tpu.dot_dimension_numbers<[1], [0], [0], [1], [0, 0, 1, 1], [], []>} : vector<8x16xf32>, vector<16x16xf32>, vector<8x16xf32> -> vector<8x16xf32>
    %336 = vector.extract_strided_slice %335 {offsets = [0, 0], sizes = [8, 8], strides = [1, 1]} : vector<8x16xf32> to vector<8x8xf32>
    %337 = arith.addf %332, %336 : vector<8x8xf32>
    %c23 = arith.constant 23 : index
    %338 = memref.load %arg8[%c23] : memref<27xf32, #tpu.memory_space<smem>>
    %339 = vector.broadcast %338 : f32 to vector<8x8xf32>
    %340 = arith.addf %337, %339 : vector<8x8xf32>
    %c25 = arith.constant 25 : index
    %341 = memref.load %arg8[%c25] : memref<27xf32, #tpu.memory_space<smem>>
    %342 = vector.broadcast %341 : f32 to vector<8x8xf32>
    %343 = arith.mulf %342, %319 : vector<8x8xf32>
    %c26 = arith.constant 26 : index
    %344 = memref.load %arg8[%c26] : memref<27xf32, #tpu.memory_space<smem>>
    %345 = vector.broadcast %344 : f32 to vector<8x8xf32>
    %346 = arith.mulf %345, %326 : vector<8x8xf32>
    %347 = arith.addf %343, %346 : vector<8x8xf32>
    %c24 = arith.constant 24 : index
    %348 = memref.load %arg8[%c24] : memref<27xf32, #tpu.memory_space<smem>>
    %cst_113 = arith.constant 0.000000e+00 : f32
    %349 = vector.broadcast %cst_113 : f32 to vector<8x8xf32>
    %350 = arith.cmpf oge, %340, %349 : vector<8x8xf32>
    %351 = vector.broadcast %348 : f32 to vector<8x8xf32>
    %352 = arith.mulf %340, %351 : vector<8x8xf32>
    %353 = arith.select %350, %340, %352 : vector<8x8xi1>, vector<8x8xf32>
    %354 = arith.mulf %353, %2 : vector<8x8xf32>
    %355 = arith.addf %354, %347 : vector<8x8xf32>
    %356 = arith.negf %355 : vector<8x8xf32>
    %357 = math.exp %356 : vector<8x8xf32>
    %cst_114 = arith.constant 1.000000e+00 : f32
    %358 = vector.broadcast %cst_114 : f32 to vector<8x8xf32>
    %359 = arith.addf %358, %357 : vector<8x8xf32>
    %360 = arith.divf %358, %359 : vector<8x8xf32>
    %361 = arith.mulf %360, %76 : vector<8x8xf32>
    %362 = arith.addf %361, %81 : vector<8x8xf32>
    %cst_115 = arith.constant 0.000000e+00 : f32
    %363 = vector.broadcast %cst_115 : f32 to vector<8x8xf32>
    %364 = arith.cmpf one, %362, %363 : vector<8x8xf32>
    %cst_116 = arith.constant -8.99999982E+20 : f32
    %365 = vector.broadcast %cst_116 : f32 to vector<8x8xf32>
    %366 = arith.select %364, %362, %365 : vector<8x8xi1>, vector<8x8xf32>
    %cst_117 = arith.constant dense<0xFF800000> : vector<8xf32>
    %367 = vector.multi_reduction <maximumf>, %366, %cst_117 [1] : vector<8x8xf32> to vector<8xf32>
    %368 = vector.shape_cast %367 : vector<8xf32> to vector<8x1xf32>
    %369 = vector.broadcast %368 : vector<8x1xf32> to vector<8x8xf32>
    %370 = arith.subf %366, %369 : vector<8x8xf32>
    %371 = math.exp %370 : vector<8x8xf32>
    %cst_118 = arith.constant dense<0.000000e+00> : vector<8xf32>
    %372 = vector.multi_reduction <add>, %371, %cst_118 [1] : vector<8x8xf32> to vector<8xf32>
    %373 = vector.shape_cast %372 : vector<8xf32> to vector<8x1xf32>
    %374 = tpu.reciprocal %373 {approx = true} : vector<8x1xf32> -> vector<8x1xf32>
    %375 = vector.broadcast %374 : vector<8x1xf32> to vector<8x8xf32>
    %376 = arith.mulf %371, %375 : vector<8x8xf32>
    %c0_119 = arith.constant 0 : index
    %c0_120 = arith.constant 0 : index
    %377 = vector.load %arg9[%c0_119, %c0_120] : memref<8x8xf32, #tpu.memory_space<vmem>>, vector<8x8xf32>
    tpu.vector_store %arg9[%c0_119, %c0_120], %376 {strides = array<i32>} : memref<8x8xf32, #tpu.memory_space<vmem>>, vector<8x8xf32>,
    return
  }
  func.func @transform_0(%arg0: i32) -> (i32, i32) {
    %c0_i32 = arith.constant 0 : i32
    %c0_i32_0 = arith.constant 0 : i32
    return %arg0, %c0_i32 : i32, i32
  }
  func.func @transform_1(%arg0: i32) -> (i32, i32) {
    %c0_i32 = arith.constant 0 : i32
    %c0_i32_0 = arith.constant 0 : i32
    return %arg0, %c0_i32 : i32, i32
  }
  func.func @transform_2(%arg0: i32) -> (i32, i32) {
    %c0_i32 = arith.constant 0 : i32
    %c0_i32_0 = arith.constant 0 : i32
    return %arg0, %c0_i32 : i32, i32
  }
  func.func @transform_3(%arg0: i32) -> (i32, i32) {
    %c0_i32 = arith.constant 0 : i32
    %c0_i32_0 = arith.constant 0 : i32
    return %arg0, %c0_i32 : i32, i32
  }
  func.func @transform_4(%arg0: i32) -> (i32, i32) {
    %c0_i32 = arith.constant 0 : i32
    %c0_i32_0 = arith.constant 0 : i32
    %c0_i32_1 = arith.constant 0 : i32
    return %c0_i32, %c0_i32_0 : i32, i32
  }
  func.func @transform_5(%arg0: i32) -> (i32, i32, i32) {
    %c0_i32 = arith.constant 0 : i32
    %c0_i32_0 = arith.constant 0 : i32
    %c0_i32_1 = arith.constant 0 : i32
    %c0_i32_2 = arith.constant 0 : i32
    return %c0_i32, %c0_i32_0, %c0_i32_1 : i32, i32, i32
  }
  func.func @transform_6(%arg0: i32) -> (i32, i32, i32) {
    %c0_i32 = arith.constant 0 : i32
    %c0_i32_0 = arith.constant 0 : i32
    %c0_i32_1 = arith.constant 0 : i32
    %c0_i32_2 = arith.constant 0 : i32
    return %c0_i32, %c0_i32_0, %c0_i32_1 : i32, i32, i32
  }
  func.func @transform_7(%arg0: i32) -> i32 {
    %c0_i32 = arith.constant 0 : i32
    %c0_i32_0 = arith.constant 0 : i32
    return %c0_i32 : i32
  }
  func.func @transform_8(%arg0: i32) -> (i32, i32) {
    %c0_i32 = arith.constant 0 : i32
    %c0_i32_0 = arith.constant 0 : i32
    return %arg0, %c0_i32 : i32, i32
  }
}

</mosaic_0001>

<bundles_post_ra>
// kernel: tpu_custom_call.1
= control target key start
LH: loop header
LB: loop body
LE: loop exit
PB: predicated region body
PF: predicated region fallthrough
CT: control target
= control target key end

     0   :  { %13 = vsyncpa [#allocation3], 0  ;;  %s3785_s27 = smov 0   ;;  %s4377_s0 = inlined_call_operand.vmem [shape: f32[16,8], index: 0, kind: input, shape index: {}]   ;;  %s4378_s1 = inlined_call_operand.vmem [shape: f32[128,8], index: 1, kind: input, shape index: {}]   ;;  %s4379_s2 = inlined_call_operand.vmem [shape: f32[16,8], index: 2, kind: input, shape index: {}]   ;;  %s4380_s3 = inlined_call_operand.vmem [shape: f32[128,1], index: 3, kind: input, shape index: {}]   ;;  %s4381_s4 = inlined_call_operand.vmem [shape: f32[208,64], index: 4, kind: input, shape index: {}]   ;;  %s4382_s5 = inlined_call_operand.vmem [shape: f32[8,16,16], index: 5, kind: input, shape index: {}]   ;;  %s4383_s6 = inlined_call_operand.vmem [shape: f32[8,16,16], index: 6, kind: input, shape index: {}]   ;;  %s4384_s7 = inlined_call_operand.vmem [shape: f32[27], index: 7, kind: input, shape index: {}]   ;;  %s4385_s8 = inlined_call_operand.vmem [shape: f32[16,8], index: 8, kind: output, shape index: {}]  }
   0x1 LB: > { %s3791_s28 = sadd.s32 4294967295, %s3728_s27   ;;  %p3168_p0 = scmp.ge.s32.totalorder %s3728_s27, 1  ;;  %s3728_s27 = sphi %s3785_s27, %s19_s27  }
   0x2   : > { %p238_p1 = scmp.lt.s32.totalorder %s3728_s27, 3  ;;  %s260_s9 = sshll.u32 %s4384_s7, 4  ;;  %s261_s9 = int_to_ptr.vmem [resolvable:$true] %s260_s9 }
   0x3   : > { %p3669_p3 = scmp.eq.s32.totalorder %s3791_s28, 0  ;;  %s3703_s11 = scalar_lea.vmem %s261_s9, 16 }
   0x4   : > { %p3798_p2 = pnand %p3168_p0, %p238_p1  ;;  %p3704_p6 = scmp.ne.s32.totalorder %s261_s9, %s3703_s11 }
   0x5   : > { %p3711_p10 = scmp.lt.s32.totalorder %s261_s9, %s261_s9  ;;  %p3712_p11 = scmp.lt.s32.totalorder %s3703_s11, %s3703_s11 }
   0x6   : > { %p3665_p4 = pneg %p3798_p2 }
   0x7   : > { %p3713_p12 = por %p3712_p11, %p3711_p10 }
   0x8   : > { %p3666_p5 = pnand %p3669_p3, %p3665_p4 }
   0xa   : > { %p3705_p7 = pneg %p3666_p5 }
   0xc   : > { %p3706_p8 = pnand %p3705_p7, %p3704_p6 }
   0xe   : > { %p3707_p9 = pneg %p3706_p8 }
  0x10   : > { %p3714_p13 = pnand %p3713_p12, %p3707_p9 }
  0x12   : > { %3717 = shalt.err (!%p3714_p13)
}
  0x13   : > { %s3730_s12 = smov [#allocation2]   ;;  %305 = sbr.rel (%p3798_p2) target bundleno = 4742 (0x1286), region = 52 }
  0x14   : > { %3668 = dma.vmem_to_smem (!%p3666_p5), %s261_s9, 16, %s3730_s12, [#allocation3]  }
  0x1a   : > { %3723 = dma.done.wait (%p3669_p3), [#allocation3], 16  }
  0x1b   : > { %3725 = vsyncadd (%p3669_p3), [#allocation3], 4294967280 }
  0x1c   : > { %311 = sfence }
  0x1d   : > { %v394_v0 = vld [vmem:[%s4381_s4] sm:$0xff]  ;;  %p352_p0 = scmp.lt.s32.totalorder %s3791_s28, 1  ;;  %v557_v1 = vld [vmem:[%s4381_s4 + $0x38] sm:$0xff]  ;;  %v3731_v2 = vmov 0.0   ;;  %vm3732_vm0 = vmmov 0   ;;  %s3174_s17 = sshll.u32 %s3791_s28, 3  ;;  %v692_v58 = vlaneseq }
  0x1e   : > { %3382 = vmatprep.subr.mxu0 %v3731_v2  ;;  %3384 = vmatprep.mubr.msk.f32.mxu0 %vm3732_vm0, %v3731_v2  ;;  %v474_v3 = vld [vmem:[%s4381_s4 + $0x10] sm:$0xff]  ;;  %v475_v4 = vld [vmem:[%s4381_s4 + $0x18] sm:$0xff]  ;;  %v3733_v5 = vmov 0.0|0.0   ;;  %p357_p1 = scmp.lt.s32.totalorder %s3174_s17, 15  ;;  %vm400_vm1 = vcmask 64512   ;;  %v476_v10 = vld [vmem:[%s4381_s4 + $0x20] sm:$0xff] }
  0x1f   : > { %3383 = vmatpush3.msra.mxu0 %v394_v0  ;;  %s4388_s28 = smov (!%p352_p0, %s3791_s28), 1  ;;  %3571 = vmatprep.subr.bf16.mxu1 %v3733_v5  ;;  %v3572_v6 = vpack.c.bf16 %v475_v4, %v474_v3  ;;  %v477_v11 = vld [vmem:[%s4381_s4 + $0x28] sm:$0xff]  ;;  %v3734_v18 = vmov 0   ;;  %vm483_vm2 = vcmask 261120   ;;  %s3735_s18 = smov 32   ;;  %v876_v39 = vld [vmem:[%s4381_s4 + $0x40] sm:$0xff] }
  0x20   : > { %3398 = vmatprep.subr.mxu0 %v557_v1  ;;  %3395 = vmatprep.mubr.msk.f32.mxu1 %vm3732_vm0, %v3731_v2  ;;  %s3834_s22 = sshll.u32 %s4388_s28, 3  ;;  %s4390_s17 = smov (!%p357_p1, %s3174_s17), 15  ;;  %v3575_v12 = vpack.c.bf16 %v477_v11, %v476_v10  ;;  %v3180_v26 = vld [vmem:[%s4381_s4 + $0x8] ss:$0 sm:$0xff]  ;;  %v878_v41 = vld [vmem:[%s4381_s4 + $0x50] sm:$0xff]  ;;  %v879_v43 = vld [vmem:[%s4381_s4 + $0x58] sm:$0xff] }
  0x21   : > { %3573 = vmatpush3.bf16.msra.mxu1 %v3572_v6  ;;  %s355_s25 = scalar_lea.vmem %s4377_s0, %s3834_s22  ;;  %s3175_s26 = sshll.u32 %s4390_s17, 3  ;;  %3689 = vset.pattern.permute.xlu0 %v3734_v18  ;;  %v877_v40 = vld [vmem:[%s4381_s4 + $0x48] sm:$0xff]  ;;  %v3581_v44 = vpack.c.bf16 %v879_v43, %v878_v41  ;;  %v880_v45 = vld [vmem:[%s4381_s4 + $0x60] sm:$0xff]  ;;  %v882_v48 = vld [vmem:[%s4381_s4 + $0x70] sm:$0xff]  ;;  %v3737_v56 = vmov 1966171168  }
  0x22   : > { %3574 = vmatprep.subr.bf16.mxu1 %v3733_v5  ;;  %v376_v7 = vld [vmem:[%s355_s25] sm:$0xff]  ;;  %s360_s28 = scalar_lea.vmem %s4378_s1, %s3175_s26  ;;  %s3859_s15 = scalar_lea.vmem %s4380_s3, %s3175_s26  ;;  %3690 = vset.pattern.permute.xlu1 %v3734_v18  ;;  %v3577_v42 = vpack.c.bf16 %v877_v40, %v876_v39  ;;  %v881_v46 = vld [vmem:[%s4381_s4 + $0x68] sm:$0xff]  ;;  %v883_v49 = vld [vmem:[%s4381_s4 + $0x78] sm:$0xff]  ;;  %v690_v57 = vunpack.c.l.s4 %v3737_v56  ;;  %v3916_v60 = vshrl.u32 %v692_v58, 7  ;;  %vm884_vm3 = vcmask 523264  }
  0x23   : > { %3385 = vmatmul.mubr.msk.f32.vlgmr.msra.gmra.mrb[0].mxu0 %vm400_vm1, %v376_v7  ;;  %v377_v8 = vld [vmem:[%s360_s28] sm:$0xff]  ;;  %v378_v9 = vld [vmem:[%s360_s28 + $0x8] sm:$0xff]  ;;  %v379_v13 = vld [vmem:[%s360_s28 + $0x10] sm:$0xff]  ;;  %v3585_v47 = vpack.c.bf16 %v881_v46, %v880_v45  ;;  %v3589_v50 = vpack.c.bf16 %v883_v49, %v882_v48  ;;  %s3736_s19 = smov 96   ;;  %s1014_s14 = sld [smem:[#allocation2]]  ;;  %vm1084_vm12 = vcmask 1040384  }
  0x24   : > { %3399 = vmatpush3.msra.mxu0 %v557_v1  ;;  %3400 = vmatprep.mubr.msk.f32.mxu0 %vm400_vm1, %v377_v8  ;;  %v380_v14 = vld [vmem:[%s360_s28 + $0x18] sm:$0xff]  ;;  %v381_v15 = vld [vmem:[%s360_s28 + $0x20] sm:$0xff]  ;;  %v382_v16 = vld [vmem:[%s360_s28 + $0x28] sm:$0xff]  ;;  %v691_v59 = vunpack.c.0.s8 %v690_v57  ;;  %v3920_v10 = vsub.s32 0, %v3916_v60  ;;  %vm1450_vm13 = vcmask 130048   ;;  %vm1345_vm14 = vcmask 1042434   ;;  %s365_s20 = scalar_lea.vmem %s4379_s2, %s3834_s22 }
  0x25   : > { %3576 = vmatpush3.bf16.msra.mxu1 %v3575_v12  ;;  %v383_v17 = vld [vmem:[%s360_s28 + $0x30] sm:$0xff]  ;;  %v386_v19 = vld [vmem:[%s3859_s15] sm:$0xff]  ;;  %v384_v21 = vld [vmem:[%s360_s28 + $0x38] sm:$0xff]  ;;  %3578 = vmatprep.subr.bf16.mxu0 %v3577_v42  ;;  %vm1343_vm15 = vcmask 1041409   ;;  %s3202_s26 = sld [smem:[#allocation2 + $0x1]]  ;;  %s3738_s28 = smov 120  }
  0x26   : > { %3593 = vmatprep.subr.bf16.mxu1 %v3733_v5  ;;  %790 = vperm.xlu0 %3689, %v386_v19   ;;  %v388_v20 = vld [vmem:[%s3859_s15 + $0x10] sm:$0xff]  ;;  %v387_v22 = vld [vmem:[%s3859_s15 + $0x8] sm:$0xff]  ;;  %v390_v23 = vld [vmem:[%s3859_s15 + $0x20] sm:$0xff]  ;;  %v694_v63 = vsub.s32 %v691_v59, %v3916_v60  ;;  %s3209_s16 = sld [smem:[#allocation2 + $0x9]]  ;;  %s3208_s17 = sld [smem:[#allocation2 + $0x2]] }
  0x27   : > { %3401 = vmatmul.mubr.msk.f32.vlgmr.msra.gmra.mrb[2].mxu0 %vm400_vm1, %v378_v9  ;;  %800 = vperm.xlu1 %3690, %v388_v20   ;;  %v389_v24 = vld [vmem:[%s3859_s15 + $0x18] sm:$0xff]  ;;  %v391_v25 = vld [vmem:[%s3859_s15 + $0x28] sm:$0xff]  ;;  %v3182_v51 = vld [vmem:[%s4381_s4 + $0x30] ss:$0 sm:$0xff]  ;;  %s3739_s21 = smov 8   ;;  %s3219_s11 = sld [smem:[#allocation2 + $0xb]] }
  0x28   : > { %3403 = vmatprep.mubr.msk.f32.mxu0 %vm400_vm1, %v379_v13  ;;  %v393_v32 = vld [vmem:[%s3859_s15 + $0x38] sm:$0xff]  ;;  %3580 = vmatpush3.bf16.msra.mxu0 %v3577_v42  ;;  %v392_v55 = vld [vmem:[%s3859_s15 + $0x30] sm:$0xff]  ;;  %s3218_s12 = sld [smem:[#allocation2 + $0x3]]  ;;  %s3220_s13 = sld [smem:[#allocation2 + $0xc]] }
  0x29   : > { %3582 = vmatprep.subr.bf16.mxu0 %v3581_v44  ;;  %s3229_s24 = sld [smem:[#allocation2 + $0xd]]  ;;  %s3228_s25 = sld [smem:[#allocation2 + $0x4]] }
  0x2a   : > { %795 = vperm.xlu0 %3689, %v387_v22   ;;  %s3249_s30 = sld [smem:[#allocation2 + $0x11]]  ;;  %s3248_s9 = sld [smem:[#allocation2 + $0x6]] }
  0x2b   : > { %3404 = vmatmul.mubr.msk.f32.gmra.mrb[4].mxu0 %vm400_vm1, %v380_v14  ;;  %810 = vperm.xlu1 %3690, %v390_v23   ;;  %s3250_s10 = sld [smem:[#allocation2 + $0x12]]  ;;  %s3260_s23 = sld [smem:[#allocation2 + $0x14]] }
  0x2c   : > { %3406 = vmatprep.mubr.msk.f32.mxu0 %vm400_vm1, %v381_v15  ;;  %3584 = vmatpush3.bf16.msra.mxu0 %v3581_v44  ;;  %s3279_s15 = sld [smem:[#allocation2 + $0x19]] }
  0x2d   : > { %3586 = vmatprep.subr.bf16.mxu0 %v3585_v47 }
  0x2e   : > { %805 = vperm.xlu0 %3689, %v389_v24  }
  0x2f   : > { %3407 = vmatmul.mubr.msk.f32.gmra.mrb[6].mxu0 %vm400_vm1, %v382_v16 }
  0x30   : > { %3409 = vmatprep.mubr.msk.f32.mxu0 %vm400_vm1, %v383_v17  ;;  %3588 = vmatpush3.bf16.msra.mxu0 %v3585_v47 }
  0x31   : > { %3590 = vmatprep.subr.bf16.mxu0 %v3589_v50 }
  0x32   : > { %815 = vperm.xlu0 %3689, %v391_v25  }
  0x33   : > { %3410 = vmatmul.mubr.msk.f32.gmra.mrb[8].mxu0 %vm400_vm1, %v384_v21 }
  0x34   : > { %3592 = vmatpush3.bf16.msra.mxu0 %v3589_v50 }
  0x35   : > { %3616 = vmatprep.subr.bf16.mxu0 %v3733_v5 }
  0xa5   : > { %v791_v61 = vpop.permute.xlu0 %790 }
  0xa6   : > { %v801_v62 = vpop.permute.xlu1 %800 }
  0xa9   : > { %v796_v0 = vpop.permute.xlu0 %795 }
  0xaa   : > { %v811_v3 = vpop.permute.xlu1 %810 }
  0xad   : > { %v806_v6 = vpop.permute.xlu0 %805 }
  0xb1   : > { %v816_v11 = vpop.permute.xlu0 %815 }
  0xf6   : > { %v470_v27 = vpop.f32.mrb[0].mxu0 }
  0xf7   : > { %v471_v28 = vadd.f32 %v3180_v26, %v470_v27  ;;  %v3386_v29 = vpop.f32.mrb[1].mxu0 }
  0xf9   : > { %3396 = vmatmul.mubr.msk.f32.vlgmr.msra.gmra.mrb[0].mxu1 %vm483_vm2, %v471_v28 }
  0xfa   : > { %3456 = vmatprep.mubr.msk.f32.mxu1 %vm3732_vm0, %v3731_v2  ;;  %v3402_v30 = vpop.f32.mrb[2].mxu0 }
  0xfb   : > { %846 = vrot.lane.b32.xlu0 %v3402_v30, %s3735_s18  ;;  %v648_v31 = vpop.f32.mrb[3].mxu0 }
  0xfc   : > { %844 = vrot.lane.b32.xlu1 %v648_v31, %s3735_s18 }
  0xfe   : > { %v3405_v33 = vpop.f32.mrb[4].mxu0 }
  0xff   : > { %825 = vperm.xlu0 %3689, %v393_v32   ;;  %v658_v34 = vpop.f32.mrb[5].mxu0 }
 0x102   : > { %v3408_v35 = vpop.f32.mrb[6].mxu0 }
 0x103   : > { %850 = vrot.lane.b32.xlu0 %v3405_v33, %s3735_s18  ;;  %v668_v36 = vpop.f32.mrb[7].mxu0 }
 0x106   : > { %v3411_v37 = vpop.f32.mrb[8].mxu0 }
 0x107   : > { %854 = vrot.lane.b32.xlu0 %v3408_v35, %s3735_s18  ;;  %v678_v38 = vpop.f32.mrb[9].mxu0 }
 0x10b   : > { %858 = vrot.lane.b32.xlu0 %v3411_v37, %s3735_s18 }
 0x16d   : > { %v847_v20 = vpop.permute.xlu0 %846 }
 0x16e   : > { %v845_v7 = vpop.permute.xlu1 %844 }
 0x17e   : > { %v826_v27 = vpop.permute.xlu0 %825 }
 0x182   : > { %v851_v33 = vpop.permute.xlu0 %850 }
 0x186   : > { %v855_v46 = vpop.permute.xlu0 %854 }
 0x18a   : > { %v859_v59 = vpop.permute.xlu0 %858 }
 0x1cc   : > { %v553_v52 = vpop.f32.mrb[0].mxu1 }
 0x1cd   : > { %v554_v53 = vadd.f32 %v3182_v51, %v553_v52  ;;  %v3397_v54 = vpop.f32.mrb[1].mxu1 }
 0x1cf   : > { %777 = vrot.lane.b32.xlu1 %v554_v53, %s3736_s19  ;;  %v695_v1 = vrot.slane %v554_v53, %v694_v63  ;;  %v688_v15 = vcombine.high %v554_v53, %v554_v53  ;;  %s3210_s19 = sld [smem:[#allocation2 + $0xa]] }
 0x1d1   : > { %v703_v4 = vcombine.high %v695_v1, %v695_v1  ;;  %v711_v8 = vrot.slane %v695_v1, %v694_v63  ;;  %v702_v21 = vrot.slane %v688_v15, %v694_v63  ;;  %v1086_v1 = vld [vmem:[%s4381_s4 + $0x80] sm:$0xff] }
 0x1d3   : > { %820 = vperm.xlu1 %3690, %v392_v55   ;;  %v725_v9 = vrot.slane %v703_v4, %v694_v63  ;;  %v740_v12 = vrot.slane %v711_v8, %v3920_v10  ;;  %v704_v24 = vcombine.high %v702_v21, %v702_v21  ;;  %v733_v26 = vcombine.high %v711_v8, %v711_v8 }
 0x1d4   : > { %v718_v30 = vrot.slane %v702_v21, %v694_v63 }
 0x1d5   : > { %v744_v13 = vrot.slane %v725_v9, %v3920_v10  ;;  %v735_v25 = vcombine.high %v725_v9, %v725_v9  ;;  %v732_v28 = vrot.slane %v704_v24, %v694_v63  ;;  %v748_v31 = vrot.slane %v733_v26, %v3920_v10  ;;  %v1090_v9 = vld [vmem:[%s4381_s4 + $0xa0] sm:$0xff] }
 0x1d6   : > { %v734_v41 = vcombine.high %v718_v30, %v718_v30 }
 0x1d7   : > { %848 = vrot.lane.b32.xlu1 %v658_v34, %s3735_s18  ;;  %v752_v29 = vrot.slane %v735_v25, %v3920_v10  ;;  %v760_v35 = vrot.slane %v732_v28, %v3920_v10 }
 0x1d8   : > { %v764_v51 = vrot.slane %v734_v41, %v3920_v10 }
 0x1db   : > { %852 = vrot.lane.b32.xlu1 %v668_v36, %s3735_s18  ;;  %v736_v36 = vcombine.high %v732_v28, %v732_v28 }
 0x1dd   : > { %v768_v44 = vrot.slane %v736_v36, %v3920_v10 }
 0x1df   : > { %856 = vrot.lane.b32.xlu1 %v678_v38, %s3735_s18  ;;  %v756_v38 = vrot.slane %v718_v30, %v3920_v10  ;;  %s3259_s18 = sld [smem:[#allocation2 + $0x13]] }
 0x241   : > { %v778_v14 = vpop.permute.xlu1 %777 }
 0x242   : > { %v780_v16 = vmul.f32 %v778_v14, %v740_v12  ;;  %v781_v17 = vmul.f32 %v778_v14, %v744_v13  ;;  %v783_v32 = vmul.f32 %v778_v14, %v752_v29  ;;  %v782_v34 = vmul.f32 %v778_v14, %v748_v31  ;;  %v1092_v13 = vld [vmem:[%s4381_s4 + $0xb0] sm:$0xff] }
 0x243   : > { %v785_v39 = vmul.f32 %v778_v14, %v760_v35  ;;  %v784_v43 = vmul.f32 %v778_v14, %v756_v38  ;;  %v787_v49 = vmul.f32 %v778_v14, %v768_v44  ;;  %v786_v54 = vmul.f32 %v778_v14, %v764_v51  ;;  %v1093_v14 = vld [vmem:[%s4381_s4 + $0xb8] sm:$0xff] }
 0x244   : > { %v828_v18 = vmul.f32 %v791_v61, %v780_v16  ;;  %v829_v19 = vmul.f32 %v796_v0, %v781_v17  ;;  %v831_v40 = vmul.f32 %v806_v6, %v783_v32  ;;  %v830_v42 = vmul.f32 %v801_v62, %v782_v34  ;;  %v1088_v6 = vld [vmem:[%s4381_s4 + $0x90] sm:$0xff] }
 0x245   : > { %v833_v48 = vmul.f32 %v816_v11, %v785_v39  ;;  %v832_v52 = vmul.f32 %v811_v3, %v784_v43  ;;  %v835_v57 = vmul.f32 %v826_v27, %v787_v49  ;;  %v1087_v3 = vld [vmem:[%s4381_s4 + $0x88] sm:$0xff]  ;;  %v3603_v15 = vpack.c.bf16 %v1093_v14, %v1092_v13 }
 0x246   : > { %v868_v22 = vsel %vm483_vm2, %v828_v18, %v845_v7  ;;  %v869_v23 = vsel %vm483_vm2, %v829_v19, %v847_v20  ;;  %v871_v50 = vsel %vm483_vm2, %v831_v40, %v851_v33  ;;  %v3594_v4 = vpack.c.bf16 %v1087_v3, %v1086_v1  ;;  %v1089_v7 = vld [vmem:[%s4381_s4 + $0x98] sm:$0xff]  ;;  %v1091_v11 = vld [vmem:[%s4381_s4 + $0xa8] sm:$0xff] }
 0x247   : > { %3428 = vmatprep.mubr.msk.f32.mxu0 %vm884_vm3, %v868_v22  ;;  %v873_v56 = vsel %vm483_vm2, %v833_v48, %v855_v46  ;;  %v875_v0 = vsel %vm483_vm2, %v835_v57, %v859_v59  ;;  %v3597_v8 = vpack.c.bf16 %v1089_v7, %v1088_v6  ;;  %v3600_v12 = vpack.c.bf16 %v1091_v11, %v1090_v9  ;;  %v4020_v7 = vld [vmem:[%s4381_s4 + $0xc8] ss:$0 sm:$0xff] }
 0x248   : > { %3429 = vmatmul.mubr.msk.f32.vlgmr.msra.gmra.mrb[10].mxu0 %vm884_vm3, %v869_v23  ;;  %3595 = vmatpush3.bf16.msra.mxu1 %v3594_v4  ;;  %v1023_v16 = vstv %s1014_s14 }
 0x249   : > { %3596 = vmatprep.subr.bf16.mxu1 %v3733_v5 }
 0x24c   : > { %3598 = vmatpush3.bf16.msra.mxu1 %v3597_v8 }
 0x24d   : > { %3599 = vmatprep.subr.bf16.mxu1 %v3733_v5 }
 0x250   : > { %3601 = vmatpush3.bf16.msra.mxu1 %v3600_v12 }
 0x251   : > { %3602 = vmatprep.subr.bf16.mxu1 %v3733_v5 }
 0x252   : > { %v821_v37 = vpop.permute.xlu1 %820 }
 0x253   : > { %v834_v61 = vmul.f32 %v821_v37, %v786_v54 }
 0x254   : > { %3604 = vmatpush3.bf16.msra.mxu1 %v3603_v15 }
 0x256   : > { %v849_v45 = vpop.permute.xlu1 %848 }
 0x257   : > { %v870_v47 = vsel %vm483_vm2, %v830_v42, %v849_v45 }
 0x258   : > { %3431 = vmatprep.mubr.msk.f32.mxu0 %vm884_vm3, %v870_v47 }
 0x259   : > { %3432 = vmatmul.mubr.msk.f32.gmra.mrb[12].mxu0 %vm884_vm3, %v871_v50 }
 0x25a   : > { %v853_v53 = vpop.permute.xlu1 %852 }
 0x25b   : > { %v872_v55 = vsel %vm483_vm2, %v832_v52, %v853_v53 }
 0x25c   : > { %3434 = vmatprep.mubr.msk.f32.mxu0 %vm884_vm3, %v872_v55 }
 0x25d   : > { %3435 = vmatmul.mubr.msk.f32.gmra.mrb[14].mxu0 %vm884_vm3, %v873_v56 }
 0x25e   : > { %v857_v62 = vpop.permute.xlu1 %856 }
 0x25f   : > { %v874_v63 = vsel %vm483_vm2, %v834_v61, %v857_v62  ;;  %vm1347_vm2 = vcmask 1043459  }
 0x260   : > { %3437 = vmatprep.mubr.msk.f32.mxu0 %vm884_vm3, %v874_v63 }
 0x261   : > { %3438 = vmatmul.mubr.msk.f32.gmra.mrb[16].mxu0 %vm884_vm3, %v875_v0 }
 0x262   : > { %3484 = vmatprep.mubr.msk.f32.mxu0 %vm3732_vm0, %v3731_v2 }
 0x31b   : > { %v3430_v17 = vpop.f32.mrb[10].mxu0 }
 0x31c   : > { %vm1016_vm4 = vcmp.ge.f32.partialorder %v3430_v17, 0.0  ;;  %v1025_v18 = vmul.f32 %v3430_v17, %v1023_v16  ;;  %v975_v19 = vpop.f32.mrb[11].mxu0 }
 0x31d   : > { %vm1015_vm5 = vcmp.ge.f32.partialorder %v975_v19, 0.0  ;;  %v1024_v20 = vmul.f32 %v1023_v16, %v975_v19 }
 0x31e   : > { %v3975_v21 = vsel %vm1016_vm4, %v3430_v17, %v1025_v18  ;;  %vm1349_vm4 = vcmask 1044484  }
 0x31f   : > { %v1062_v22 = vsel %vm884_vm3, %v3975_v21, 0.0  ;;  %v1041_v23 = vsel %vm884_vm3, %v3975_v21, -inf  ;;  %v3981_v24 = vsel %vm1015_vm5, %v975_v19, %v1024_v20  ;;  %vm1351_vm5 = vcmask 1045509  }
 0x320   : > { %1203 = vadd.xlane.f32.xlu0 %v1062_v22  ;;  %1227 = vmax.xlane.f32.xlu1 %v1041_v23  ;;  %v1061_v25 = vsel %vm884_vm3, %v3981_v24, 0.0  ;;  %v1040_v27 = vsel %vm884_vm3, %v3981_v24, -inf }
 0x321   : > { %v1063_v26 = vadd.f32 %v1062_v22, %v1061_v25 }
 0x324   : > { %1201 = vadd.xlane.f32.xlu1 %v1061_v25  ;;  %1225 = vmax.xlane.f32.xlu0 %v1040_v27 }
 0x32c   : > { %v3433_v28 = vpop.f32.mrb[12].mxu0 }
 0x32d   : > { %vm1018_vm6 = vcmp.ge.f32.partialorder %v3433_v28, 0.0  ;;  %v1027_v29 = vmul.f32 %v3433_v28, %v1023_v16  ;;  %v985_v30 = vpop.f32.mrb[13].mxu0 }
 0x32e   : > { %vm1017_vm7 = vcmp.ge.f32.partialorder %v985_v30, 0.0  ;;  %v1026_v31 = vmul.f32 %v1023_v16, %v985_v30 }
 0x32f   : > { %v3987_v32 = vsel %vm1018_vm6, %v3433_v28, %v1027_v29  ;;  %vm1353_vm6 = vcmask 1046534  }
 0x330   : > { %v3436_v33 = vpop.f32.mrb[14].mxu0  ;;  %v1066_v34 = vsel %vm884_vm3, %v3987_v32, 0.0  ;;  %v3991_v35 = vsel %vm1017_vm7, %v985_v30, %v1026_v31  ;;  %v1043_v41 = vsel %vm884_vm3, %v3987_v32, -inf  ;;  %v1448_v30 = vld [vmem:[%s4382_s5] sm:$0xff]  ;;  %vm1355_vm7 = vcmask 1047559  }
 0x331   : > { %vm1020_vm8 = vcmp.ge.f32.partialorder %v3436_v33, 0.0  ;;  %v1029_v36 = vmul.f32 %v3436_v33, %v1023_v16  ;;  %1207 = vadd.xlane.f32.xlu1 %v1066_v34  ;;  %v995_v37 = vpop.f32.mrb[15].mxu0  ;;  %v1064_v38 = vsel %vm884_vm3, %v3991_v35, 0.0  ;;  %v1042_v57 = vsel %vm884_vm3, %v3991_v35, -inf }
 0x332   : > { %vm1019_vm9 = vcmp.ge.f32.partialorder %v995_v37, 0.0  ;;  %v1028_v39 = vmul.f32 %v1023_v16, %v995_v37  ;;  %1205 = vadd.xlane.f32.xlu0 %v1064_v38  ;;  %v1065_v40 = vadd.f32 %v1064_v38, %v1063_v26 }
 0x333   : > { %v3997_v42 = vsel %vm1020_vm8, %v3436_v33, %v1029_v36 }
 0x334   : > { %v3439_v43 = vpop.f32.mrb[16].mxu0  ;;  %v1070_v44 = vsel %vm884_vm3, %v3997_v42, 0.0  ;;  %v4001_v45 = vsel %vm1019_vm9, %v995_v37, %v1028_v39  ;;  %v1067_v46 = vadd.f32 %v1066_v34, %v1065_v40  ;;  %v1046_v47 = vsel %vm884_vm3, %v3997_v42, -inf }
 0x335   : > { %vm1022_vm10 = vcmp.ge.f32.partialorder %v3439_v43, 0.0  ;;  %v1031_v48 = vmul.f32 %v3439_v43, %v1023_v16  ;;  %1231 = vmax.xlane.f32.xlu1 %v1043_v41  ;;  %v1005_v49 = vpop.f32.mrb[17].mxu0  ;;  %v1068_v50 = vsel %vm884_vm3, %v4001_v45, 0.0  ;;  %v1047_v51 = vmax.f32 %v1041_v23, %v1046_v47 }
 0x336   : > { %vm1021_vm11 = vcmp.ge.f32.partialorder %v1005_v49, 0.0  ;;  %v1030_v52 = vmul.f32 %v1023_v16, %v1005_v49  ;;  %1211 = vadd.xlane.f32.xlu0 %v1070_v44  ;;  %v1069_v53 = vadd.f32 %v1068_v50, %v1067_v46  ;;  %v1044_v54 = vsel %vm884_vm3, %v4001_v45, -inf }
 0x337   : > { %v4009_v55 = vsel %vm1022_vm10, %v3439_v43, %v1031_v48  ;;  %v1045_v56 = vmax.f32 %v1040_v27, %v1044_v54  ;;  %v1310_v40 = vand.u32 127, %v692_v58 }
 0x338   : > { %v1038_v59 = vsel %vm1021_vm11, %v1005_v49, %v1030_v52  ;;  %v1071_v61 = vadd.f32 %v1070_v44, %v1069_v53  ;;  %v1050_v62 = vsel %vm884_vm3, %v4009_v55, -inf  ;;  %v1074_v8 = vsel %vm884_vm3, %v4009_v55, 0.0 }
 0x339   : > { %1229 = vmax.xlane.f32.xlu1 %v1042_v57  ;;  %v1052_v63 = vmax.f32 %v1045_v56, %v1047_v51  ;;  %v1072_v0 = vsel %vm884_vm3, %v1038_v59, 0.0  ;;  %v1051_v1 = vmax.f32 %v1043_v41, %v1050_v62  ;;  %v1048_v3 = vsel %vm884_vm3, %v1038_v59, -inf }
 0x33a   : > { %1209 = vadd.xlane.f32.xlu0 %v1068_v50  ;;  %v1073_v4 = vadd.f32 %v1072_v0, %v1071_v61  ;;  %v1049_v6 = vmax.f32 %v1042_v57, %v1048_v3  ;;  %v4025_v9 = vmul.f32 %v4020_v7, %v1038_v59  ;;  %v4039_v46 = vsub.s32 %v1310_v40, %v3916_v60 }
 0x33b   : > { %v1406_v51 = vadd.s32 4294967288, %v1310_v40 }
 0x33c   : > { %v1075_v11 = vadd.f32 %v1074_v8, %v1073_v4  ;;  %v1053_v12 = vmax.f32 %v1049_v6, %v1051_v1 }
 0x33d   : > { %1235 = vmax.xlane.f32.xlu1 %v1046_v47 }
 0x33e   : > { %1215 = vadd.xlane.f32.xlu0 %v1074_v8  ;;  %v1076_v13 = vrot.slane %v1075_v11, 4  ;;  %v1054_v14 = vmax.f32 %v1052_v63, %v1053_v12 }
 0x340   : > { %v1077_v15 = vadd.f32 %v1076_v13, %v1075_v11  ;;  %v1055_v16 = vrot.slane %v1054_v14, 4 }
 0x341   : > { %1233 = vmax.xlane.f32.xlu1 %v1044_v54 }
 0x342   : > { %1213 = vadd.xlane.f32.xlu0 %v1072_v0  ;;  %v1078_v17 = vrot.slane %v1077_v15, 2  ;;  %v1056_v18 = vmax.f32 %v1054_v14, %v1055_v16  ;;  %v1409_v0 = vsub.s32 %v1406_v51, %v3916_v60 }
 0x344   : > { %v1079_v19 = vadd.f32 %v1078_v17, %v1077_v15  ;;  %v1057_v20 = vrot.slane %v1056_v18, 2 }
 0x345   : > { %1239 = vmax.xlane.f32.xlu1 %v1050_v62 }
 0x346   : > { %v1080_v22 = vrot.slane %v1079_v19, 1  ;;  %1237 = vmax.xlane.f32.xlu0 %v1048_v3  ;;  %v1058_v23 = vmax.f32 %v1056_v18, %v1057_v20 }
 0x348   : > { %v1081_v25 = vadd.f32 %v1080_v22, %v1079_v19  ;;  %v1059_v26 = vrot.slane %v1058_v23, 1 }
 0x34a   : > { %v1083_v27 = vmul.f32 0.015625, %v1081_v25  ;;  %v1060_v28 = vmax.f32 %v1058_v23, %v1059_v26 }
 0x34c   : > { %v4027_v29 = vsel %vm1084_vm12, %v1060_v28, %v1083_v27 }
 0x34d   : > { %3457 = vmatmul.mubr.msk.f32.vlgmr.msra.gmra.mrb[2].mxu1 %vm884_vm3, %v4027_v29 }
 0x34e   : > { %3463 = vmatprep.mubr.msk.f32.mxu1 %vm1450_vm13, %v1448_v30 }
 0x3ad   : > { %v1228_v31 = vpop.xlane.xlu1 %1227  ;;  %v1204_v33 = vpop.xlane.xlu0 %1203 }
 0x3ae   : > { %v1218_v47 = vmul.f32 0.015625, %v1204_v33  ;;  %v1373_v61 = vrot.slane %v1228_v31, %v4039_v46  ;;  %v1414_v18 = vrot.slane %v1228_v31, %v1409_v0 }
 0x3b0   : > { %v1318_v54 = vrot.slane %v1218_v47, %v4039_v46 }
 0x3b1   : > { %v1202_v34 = vpop.xlane.xlu1 %1201  ;;  %v1226_v36 = vpop.xlane.xlu0 %1225 }
 0x3b2   : > { %v1217_v41 = vmul.f32 0.015625, %v1202_v34  ;;  %v1369_v56 = vrot.slane %v1226_v36, %v4039_v46  ;;  %v1410_v11 = vrot.slane %v1226_v36, %v1409_v0 }
 0x3b4   : > { %v1314_v49 = vrot.slane %v1217_v41, %v4039_v46  ;;  %v1398_v4 = vsel %vm1343_vm15, %v1373_v61, %v1369_v56  ;;  %v1439_v26 = vsel %vm1343_vm15, %v1414_v18, %v1410_v11  ;;  %v1532_v56 = vld [vmem:[%s4383_s6] sm:$0xff] }
 0x3b6   : > { %v1344_v62 = vsel %vm1343_vm15, %v1318_v54, %v1314_v49 }
 0x3be   : > { %v1208_v37 = vpop.xlane.xlu1 %1207 }
 0x3bf   : > { %v1206_v38 = vpop.xlane.xlu0 %1205  ;;  %v1220_v58 = vmul.f32 0.015625, %v1208_v37 }
 0x3c0   : > { %v1219_v44 = vmul.f32 0.015625, %v1206_v38 }
 0x3c1   : > { %v1326_v6 = vrot.slane %v1220_v58, %v4039_v46  ;;  %v1533_v58 = vld [vmem:[%s4383_s6 + $0x8] sm:$0xff] }
 0x3c2   : > { %v4035_v39 = vpop.xlane.xlu1 %1231  ;;  %v1322_v52 = vrot.slane %v1219_v44, %v4039_v46 }
 0x3c3   : > { %v1212_v43 = vpop.xlane.xlu0 %1211  ;;  %v1381_v14 = vrot.slane %v4035_v39, %v4039_v46  ;;  %v1422_v38 = vrot.slane %v4035_v39, %v1409_v0 }
 0x3c4   : > { %v1346_v1 = vsel %vm1345_vm14, %v1322_v52, %v1344_v62  ;;  %v1222_v8 = vmul.f32 0.015625, %v1212_v43  ;;  %v3610_v62 = vpack.c.bf16 %v1533_v58, %v1532_v56 }
 0x3c5   : > { %v1348_v60 = vsel %vm1347_vm2, %v1326_v6, %v1346_v1  ;;  %v1174_v6 = vstv %s3202_s26  ;;  %s3230_s26 = sld [smem:[#allocation2 + $0xe]] }
 0x3c6   : > { %v1230_v48 = vpop.xlane.xlu1 %1229  ;;  %v1334_v22 = vrot.slane %v1222_v8, %v4039_v46 }
 0x3c7   : > { %v1210_v50 = vpop.xlane.xlu0 %1209  ;;  %v1377_v57 = vrot.slane %v1230_v48, %v4039_v46  ;;  %v1418_v15 = vrot.slane %v1230_v48, %v1409_v0 }
 0x3c8   : > { %v1221_v53 = vmul.f32 0.015625, %v1210_v50 }
 0x3c9   : > { %v1399_v12 = vsel %vm1345_vm14, %v1377_v57, %v1398_v4  ;;  %v1440_v33 = vsel %vm1345_vm14, %v1418_v15, %v1439_v26 }
 0x3ca   : > { %v1236_v59 = vpop.xlane.xlu1 %1235  ;;  %v1330_v3 = vrot.slane %v1221_v53, %v4039_v46  ;;  %v1400_v25 = vsel %vm1347_vm2, %v1381_v14, %v1399_v12  ;;  %v1441_v48 = vsel %vm1347_vm2, %v1422_v38, %v1440_v33  ;;  %v3211_v33 = vld [vmem:[%s4382_s5 + $0x10] sm:$0xff] }
 0x3cb   : > { %v1216_v63 = vpop.xlane.xlu0 %1215  ;;  %v1389_v31 = vrot.slane %v1236_v59, %v4039_v46  ;;  %v1430_v53 = vrot.slane %v1236_v59, %v1409_v0  ;;  %v1449_v59 = vld [vmem:[%s4382_s5 + $0x8] sm:$0xff] }
 0x3cc   : > { %v1350_v19 = vsel %vm1349_vm4, %v1330_v3, %v1348_v60  ;;  %v1224_v23 = vmul.f32 0.015625, %v1216_v63 }
 0x3cd   : > { %v1352_v36 = vsel %vm1351_vm5, %v1334_v22, %v1350_v19  ;;  %v4112_v22 = vmul.f32 %v4020_v7, %v3987_v32  ;;  %v3215_v32 = vld [vmem:[%s4383_s6 + $0x10] sm:$0xff] }
 0x3ce   : > { %v1234_v13 = vpop.xlane.xlu1 %1233  ;;  %v1342_v43 = vrot.slane %v1224_v23, %v4039_v46 }
 0x3cf   : > { %v1385_v16 = vrot.slane %v1234_v13, %v4039_v46  ;;  %v1214_v17 = vpop.xlane.xlu0 %1213  ;;  %v1426_v34 = vrot.slane %v1234_v13, %v1409_v0 }
 0x3d0   : > { %v1223_v20 = vmul.f32 0.015625, %v1214_v17 }
 0x3d1   : > { %v1401_v27 = vsel %vm1349_vm4, %v1385_v16, %v1400_v25  ;;  %v1442_v50 = vsel %vm1349_vm4, %v1426_v34, %v1441_v48  ;;  %v1610_v34 = vstv %s3209_s16  ;;  %s3239_s16 = sld [smem:[#allocation2 + $0xf]] }
 0x3d2   : > { %v1338_v28 = vrot.slane %v1223_v20, %v4039_v46  ;;  %v1240_v30 = vpop.xlane.xlu1 %1239  ;;  %v1402_v47 = vsel %vm1351_vm5, %v1389_v31, %v1401_v27  ;;  %v1443_v57 = vsel %vm1351_vm5, %v1430_v53, %v1442_v50 }
 0x3d3   : > { %v1238_v37 = vpop.xlane.xlu0 %1237  ;;  %v1397_v44 = vrot.slane %v1240_v30, %v4039_v46  ;;  %v1438_v63 = vrot.slane %v1240_v30, %v1409_v0  ;;  %v3216_v30 = vld [vmem:[%s4383_s6 + $0x18] sm:$0xff] }
 0x3d4   : > { %v1354_v40 = vsel %vm1353_vm6, %v1338_v28, %v1352_v36  ;;  %v1393_v41 = vrot.slane %v1238_v37, %v4039_v46  ;;  %v1434_v51 = vrot.slane %v1238_v37, %v1409_v0  ;;  %v3200_v0 = vld [vmem:[%s4381_s4 + $0xc0] ss:$0 sm:$0xff]  ;;  %v3617_v31 = vpack.c.bf16 %v3216_v30, %v3215_v32  ;;  %v3222_v32 = vld [vmem:[%s4382_s5 + $0x28] sm:$0xff] }
 0x3d5   : > { %v4077_v39 = vsel %vm1355_vm7, %v1342_v43, %v1354_v40  ;;  %v1621_v37 = vstv %s3208_s17  ;;  %v1618_v40 = vstv %s3210_s19  ;;  %s3238_s17 = sld [smem:[#allocation2 + $0x5]]  ;;  %s3240_s19 = sld [smem:[#allocation2 + $0x10]] }
 0x3d6   : > { %v1403_v49 = vsel %vm1353_vm6, %v1393_v41, %v1402_v47  ;;  %v1444_v61 = vsel %vm1353_vm6, %v1434_v51, %v1443_v57  ;;  %3618 = vmatpush3.bf16.msra.mxu0 %v3617_v31  ;;  %v3212_v57 = vld [vmem:[%s4382_s5 + $0x18] sm:$0xff] }
 0x3d7   : > { %v4080_v52 = vsel %vm1355_vm7, %v1397_v44, %v1403_v49  ;;  %v1445_v1 = vsel %vm1355_vm7, %v1438_v63, %v1444_v61  ;;  %3623 = vmatprep.subr.bf16.mxu0 %v3733_v5  ;;  %v4138_v44 = vld [vmem:[%s365_s20] sm:$0xff]  ;;  %s3258_s20 = sld [smem:[#allocation2 + $0x7]] }
 0x3d8   : > { %v3605_v54 = vpack.c.bf16 %v4080_v52, %v4077_v39  ;;  %v1447_v3 = vsel %vm400_vm1, %v4077_v39, %v1445_v1 }
 0x3da   : > { %3606 = vmatprep.subr.bf16.mxu1 %v3605_v54 }
 0x3db   : > { %3608 = vmatpush3.bf16.msra.mxu1 %v3605_v54 }
 0x3dc   : > { %3609 = vmatprep.subr.bf16.mxu1 %v3733_v5 }
 0x3de   : > { %3464 = vmatmul.mubr.msk.f32.vlgmr.msra.gmra.mrb[4].mxu1 %vm1450_vm13, %v1449_v59 }
 0x3df   : > { %3611 = vmatpush3.bf16.msra.mxu1 %v3610_v62  ;;  %3470 = vmatprep.mubr.msk.f32.mxu1 %vm3732_vm0, %v3731_v2 }
 0x3e2   : > { %3471 = vmatmul.mubr.msk.f32.vlgmr.msra.gmra.mrb[6].mxu1 %vm1450_vm13, %v1447_v3  ;;  %v3225_v3 = vld [vmem:[%s4383_s6 + $0x20] sm:$0xff] }
 0x3e3   : > { %3477 = vmatprep.mubr.msk.f32.mxu1 %vm1450_vm13, %v3211_v33 }
 0x420   : > { %v1168_v4 = vpop.f32.mrb[2].mxu1 }
 0x421   : > { %v1169_v8 = vadd.f32 %v3200_v0, %v1168_v4  ;;  %v3458_v11 = vpop.f32.mrb[3].mxu1  ;;  %v3226_v0 = vld [vmem:[%s4383_s6 + $0x28] sm:$0xff]  ;;  %v3221_v4 = vld [vmem:[%s4382_s5 + $0x20] sm:$0xff] }
 0x423   : > { %vm1173_vm8 = vcmp.ge.f32.partialorder %v1169_v8, 0.0  ;;  %v1175_v12 = vmul.f32 %v1174_v6, %v1169_v8  ;;  %v3624_v6 = vpack.c.bf16 %v3226_v0, %v3225_v3  ;;  %v3232_v3 = vld [vmem:[%s4382_s5 + $0x38] sm:$0xff] }
 0x425   : > { %v1176_v13 = vsel %vm1173_vm8, %v1169_v8, %v1175_v12  ;;  %v1799_v8 = vstv %s3219_s11  ;;  %v1810_v12 = vstv %s3218_s12  ;;  %s3269_s11 = sld [smem:[#allocation2 + $0x15]]  ;;  %s3268_s12 = sld [smem:[#allocation2 + $0x8]] }
 0x426   : > { %v1177_v14 = vadd.f32 %v1176_v13, %v4027_v29 }
 0x428   : > { %v1179_v15 = vrot.slane %v1177_v14, 1 }
 0x42a   : > { %v1181_v60 = vadd.f32 %v1179_v15, %v1177_v14  ;;  %v1807_v14 = vstv %s3220_s13  ;;  %s3270_s13 = sld [smem:[#allocation2 + $0x16]] }
 0x42c   : > { %v3203_v16 = vmul.f32 -1.442695, %v1181_v60 }
 0x42e   : > { %3691 = vpow2.f32 %v3203_v16 }
 0x438   : > { %v3692_v17 = vpop.eup %3691 }
 0x439   : > { %v1185_v18 = vadd.f32 1.0, %v3692_v17 }
 0x43b   : > { %3693 = vrcp.f32 %v1185_v18 }
 0x445   : > { %v3694_v19 = vpop.eup %3693 }
 0x446   : > { %v4108_v20 = vrot.slane %v3694_v19, %v3920_v10 }
 0x448   : > { %v4116_v23 = vmul.f32 %v4108_v20, %v4112_v22  ;;  %v4120_v29 = vmul.f32 %v4108_v20, %v4025_v9 }
 0x4b1   : > { %v3465_v25 = vpop.f32.mrb[4].mxu1 }
 0x4b2   : > { %v1523_v26 = vpop.f32.mrb[5].mxu1 }
 0x4b5   : > { %v1603_v27 = vpop.f32.mrb[6].mxu1 }
 0x4b6   : > { %v1608_v28 = vadd.f32 %v1603_v27, %v1523_v26  ;;  %1613 = vrot.lane.b32.xlu0 %v1603_v27, %s3738_s28  ;;  %v3472_v10 = vpop.f32.mrb[7].mxu1 }
 0x4b8   : > { %v1611_v36 = vadd.f32 %v1610_v34, %v1608_v28 }
 0x4ba   : > { %v1622_v38 = vmul.f32 %v1621_v37, %v1611_v36  ;;  %vm1620_vm9 = vcmp.ge.f32.partialorder %v1611_v36, 0.0 }
 0x4bc   : > { %v1623_v48 = vsel %vm1620_vm9, %v1611_v36, %v1622_v38 }
 0x4bd   : > { %v1624_v50 = vmul.f32 %v1623_v48, %v4138_v44  ;;  %v1988_v48 = vstv %s3229_s24 }
 0x4bf   : > { %v1625_v56 = vadd.f32 %v1624_v50, %v4077_v39  ;;  %v1999_v50 = vstv %s3228_s25 }
 0x528   : > { %v1614_v41 = vpop.permute.xlu0 %1613 }
 0x529   : > { %v1616_v43 = vadd.f32 %v3465_v25, %v1614_v41  ;;  %v3236_v41 = vld [vmem:[%s4383_s6 + $0x38] sm:$0xff] }
 0x52b   : > { %v1619_v47 = vadd.f32 %v1618_v40, %v1616_v43  ;;  %v3235_v40 = vld [vmem:[%s4383_s6 + $0x30] sm:$0xff] }
 0x52c   : > { %v3231_v43 = vld [vmem:[%s4382_s5 + $0x30] sm:$0xff] }
 0x52d   : > { %vm1626_vm10 = vcmp.ge.f32.partialorder %v1619_v47, 0.0  ;;  %v1627_v49 = vmul.f32 %v1621_v37, %v1619_v47 }
 0x52f   : > { %v1628_v51 = vsel %vm1626_vm10, %v1619_v47, %v1627_v49  ;;  %v3631_v47 = vpack.c.bf16 %v3236_v41, %v3235_v40  ;;  %v3242_v40 = vld [vmem:[%s4382_s5 + $0x48] sm:$0xff] }
 0x530   : > { %v1629_v53 = vmul.f32 %v1628_v51, %v4138_v44 }
 0x532   : > { %v1630_v54 = vadd.f32 %v1629_v53, %v4080_v52  ;;  %v1996_v53 = vstv %s3230_s26 }
 0x534   : > { %1632 = vrot.lane.b32.xlu1 %v1630_v54, %s3739_s21  ;;  %v3612_v58 = vpack.c.bf16 %v1630_v54, %v1625_v56 }
 0x536   : > { %3613 = vmatprep.subr.bf16.mxu1 %v3612_v58 }
 0x537   : > { %3615 = vmatpush3.bf16.msra.mxu1 %v3612_v58 }
 0x53a   : > { %3478 = vmatmul.mubr.msk.f32.vlgmr.msra.gmra.mrb[8].mxu1 %vm1450_vm13, %v3212_v57 }
 0x53b   : > { %3491 = vmatprep.mubr.msk.f32.mxu1 %vm1450_vm13, %v3221_v4 }
 0x5a6   : > { %v1633_v61 = vpop.permute.xlu1 %1632 }
 0x5a7   : > { %v1635_v59 = vsel %vm400_vm1, %v1625_v56, %v1633_v61 }
 0x5a8   : > { %3485 = vmatmul.mubr.msk.f32.vlgmr.msra.gmra.mrb[18].mxu0 %vm1450_vm13, %v1635_v59 }
 0x5a9   : > { %3498 = vmatprep.mubr.msk.f32.mxu0 %vm3732_vm0, %v3731_v2  ;;  %3625 = vmatpush3.bf16.msra.mxu0 %v3624_v6 }
 0x5aa   : > { %3630 = vmatprep.subr.bf16.mxu0 %v3733_v5 }
 0x60d   : > { %v3479_v39 = vpop.f32.mrb[8].mxu1 }
 0x60e   : > { %v1711_v52 = vpop.f32.mrb[9].mxu1 }
 0x67b   : > { %v1792_v62 = vpop.f32.mrb[18].mxu0 }
 0x67c   : > { %v1797_v63 = vadd.f32 %v1792_v62, %v1711_v52  ;;  %1802 = vrot.lane.b32.xlu1 %v1792_v62, %s3738_s28  ;;  %v3486_v1 = vpop.f32.mrb[19].mxu0 }
 0x67e   : > { %v1800_v11 = vadd.f32 %v1799_v8, %v1797_v63 }
 0x680   : > { %v1811_v13 = vmul.f32 %v1810_v12, %v1800_v11  ;;  %vm1809_vm11 = vcmp.ge.f32.partialorder %v1800_v11, 0.0 }
 0x682   : > { %v1812_v17 = vsel %vm1809_vm11, %v1800_v11, %v1811_v13 }
 0x683   : > { %v1813_v19 = vmul.f32 %v1812_v17, %v4138_v44  ;;  %v2177_v17 = vstv %s3239_s16 }
 0x685   : > { %v1814_v28 = vadd.f32 %v1813_v19, %v1625_v56  ;;  %v2188_v19 = vstv %s3238_s17  ;;  %s3280_s17 = sld [smem:[#allocation2 + $0x1a]] }
 0x6ee   : > { %v1803_v15 = vpop.permute.xlu1 %1802 }
 0x6ef   : > { %v1805_v60 = vadd.f32 %v3479_v39, %v1803_v15  ;;  %v3246_v15 = vld [vmem:[%s4383_s6 + $0x48] sm:$0xff] }
 0x6f1   : > { %v1808_v16 = vadd.f32 %v1807_v14, %v1805_v60  ;;  %v3245_v14 = vld [vmem:[%s4383_s6 + $0x40] sm:$0xff] }
 0x6f2   : > { %v3241_v60 = vld [vmem:[%s4382_s5 + $0x40] sm:$0xff] }
 0x6f3   : > { %vm1815_vm12 = vcmp.ge.f32.partialorder %v1808_v16, 0.0  ;;  %v1816_v18 = vmul.f32 %v1810_v12, %v1808_v16 }
 0x6f5   : > { %v1817_v25 = vsel %vm1815_vm12, %v1808_v16, %v1816_v18  ;;  %v3638_v16 = vpack.c.bf16 %v3246_v15, %v3245_v14  ;;  %v3252_v14 = vld [vmem:[%s4382_s5 + $0x58] sm:$0xff] }
 0x6f6   : > { %v1818_v26 = vmul.f32 %v1817_v25, %v4138_v44 }
 0x6f8   : > { %v1819_v27 = vadd.f32 %v1818_v26, %v1630_v54  ;;  %v2185_v26 = vstv %s3240_s19  ;;  %s3281_s19 = sld [smem:[#allocation2 + $0x18]] }
 0x6fa   : > { %1821 = vrot.lane.b32.xlu0 %v1819_v27, %s3739_s21  ;;  %v3619_v10 = vpack.c.bf16 %v1819_v27, %v1814_v28 }
 0x6fc   : > { %3620 = vmatprep.subr.bf16.mxu1 %v3619_v10 }
 0x6fd   : > { %3622 = vmatpush3.bf16.msra.mxu1 %v3619_v10 }
 0x700   : > { %3492 = vmatmul.mubr.msk.f32.vlgmr.msra.gmra.mrb[10].mxu1 %vm1450_vm13, %v3222_v32 }
 0x701   : > { %3505 = vmatprep.mubr.msk.f32.mxu1 %vm1450_vm13, %v3231_v43 }
 0x76c   : > { %v1822_v30 = vpop.permute.xlu0 %1821 }
 0x76d   : > { %v1824_v33 = vsel %vm400_vm1, %v1814_v28, %v1822_v30 }
 0x76e   : > { %3499 = vmatmul.mubr.msk.f32.vlgmr.msra.gmra.mrb[20].mxu0 %vm1450_vm13, %v1824_v33 }
 0x76f   : > { %3512 = vmatprep.mubr.msk.f32.mxu0 %vm3732_vm0, %v3731_v2  ;;  %3632 = vmatpush3.bf16.msra.mxu0 %v3631_v47 }
 0x770   : > { %3637 = vmatprep.subr.bf16.mxu0 %v3733_v5 }
 0x7d3   : > { %v3493_v31 = vpop.f32.mrb[10].mxu1 }
 0x7d4   : > { %v1900_v34 = vpop.f32.mrb[11].mxu1 }
 0x841   : > { %v1981_v36 = vpop.f32.mrb[20].mxu0 }
 0x842   : > { %v1986_v37 = vadd.f32 %v1981_v36, %v1900_v34  ;;  %1991 = vrot.lane.b32.xlu1 %v1981_v36, %s3738_s28  ;;  %v3500_v38 = vpop.f32.mrb[21].mxu0 }
 0x844   : > { %v1989_v49 = vadd.f32 %v1988_v48, %v1986_v37 }
 0x846   : > { %v2000_v51 = vmul.f32 %v1999_v50, %v1989_v49  ;;  %vm1998_vm8 = vcmp.ge.f32.partialorder %v1989_v49, 0.0 }
 0x848   : > { %v2001_v57 = vsel %vm1998_vm8, %v1989_v49, %v2000_v51 }
 0x849   : > { %v2002_v59 = vmul.f32 %v2001_v57, %v4138_v44  ;;  %v2366_v57 = vstv %s3249_s30 }
 0x84b   : > { %v2003_v63 = vadd.f32 %v2002_v59, %v1814_v28  ;;  %v2377_v59 = vstv %s3248_s9 }
 0x8b4   : > { %v1992_v54 = vpop.permute.xlu1 %1991 }
 0x8b5   : > { %v1994_v56 = vadd.f32 %v3493_v31, %v1992_v54  ;;  %v3256_v54 = vld [vmem:[%s4383_s6 + $0x58] sm:$0xff] }
 0x8b7   : > { %v1997_v58 = vadd.f32 %v1996_v53, %v1994_v56  ;;  %v3255_v53 = vld [vmem:[%s4383_s6 + $0x50] sm:$0xff] }
 0x8b8   : > { %v3251_v56 = vld [vmem:[%s4382_s5 + $0x50] sm:$0xff] }
 0x8b9   : > { %vm2004_vm9 = vcmp.ge.f32.partialorder %v1997_v58, 0.0  ;;  %v2005_v61 = vmul.f32 %v1999_v50, %v1997_v58 }
 0x8bb   : > { %v2006_v39 = vsel %vm2004_vm9, %v1997_v58, %v2005_v61  ;;  %v3645_v58 = vpack.c.bf16 %v3256_v54, %v3255_v53 }
 0x8bc   : > { %v2007_v52 = vmul.f32 %v2006_v39, %v4138_v44 }
 0x8be   : > { %v2008_v62 = vadd.f32 %v2007_v52, %v1819_v27  ;;  %v2374_v52 = vstv %s3250_s10 }
 0x8c0   : > { %2010 = vrot.lane.b32.xlu0 %v2008_v62, %s3739_s21  ;;  %v3626_v1 = vpack.c.bf16 %v2008_v62, %v2003_v63 }
 0x8c2   : > { %3627 = vmatprep.subr.bf16.mxu1 %v3626_v1 }
 0x8c3   : > { %3629 = vmatpush3.bf16.msra.mxu1 %v3626_v1 }
 0x8c6   : > { %3506 = vmatmul.mubr.msk.f32.vlgmr.msra.gmra.mrb[12].mxu1 %vm1450_vm13, %v3232_v3 }
 0x8c7   : > { %3519 = vmatprep.mubr.msk.f32.mxu1 %vm1450_vm13, %v3241_v60 }
 0x932   : > { %v2011_v0 = vpop.permute.xlu0 %2010 }
 0x933   : > { %v2013_v4 = vsel %vm400_vm1, %v2003_v63, %v2011_v0 }
 0x934   : > { %3513 = vmatmul.mubr.msk.f32.vlgmr.msra.gmra.mrb[22].mxu0 %vm1450_vm13, %v2013_v4 }
 0x935   : > { %3526 = vmatprep.mubr.msk.f32.mxu0 %vm3732_vm0, %v3731_v2  ;;  %3639 = vmatpush3.bf16.msra.mxu0 %v3638_v16 }
 0x936   : > { %3644 = vmatprep.subr.bf16.mxu0 %v3733_v5 }
 0x999   : > { %v3507_v6 = vpop.f32.mrb[12].mxu1 }
 0x99a   : > { %v2089_v8 = vpop.f32.mrb[13].mxu1 }
 0xa07   : > { %v2170_v11 = vpop.f32.mrb[22].mxu0 }
 0xa08   : > { %v2175_v12 = vadd.f32 %v2170_v11, %v2089_v8  ;;  %2180 = vrot.lane.b32.xlu1 %v2170_v11, %s3738_s28  ;;  %v3514_v13 = vpop.f32.mrb[23].mxu0 }
 0xa0a   : > { %v2178_v18 = vadd.f32 %v2177_v17, %v2175_v12 }
 0xa0c   : > { %v2189_v25 = vmul.f32 %v2188_v19, %v2178_v18  ;;  %vm2187_vm10 = vcmp.ge.f32.partialorder %v2178_v18, 0.0 }
 0xa0e   : > { %v2190_v32 = vsel %vm2187_vm10, %v2178_v18, %v2189_v25 }
 0xa0f   : > { %v2191_v33 = vmul.f32 %v2190_v32, %v4138_v44  ;;  %v2555_v32 = vstv %s3259_s18 }
 0xa11   : > { %v2192_v37 = vadd.f32 %v2191_v33, %v2003_v63  ;;  %v2566_v33 = vstv %s3258_s20 }
 0xa7a   : > { %v2181_v27 = vpop.permute.xlu1 %2180 }
 0xa7b   : > { %v2183_v28 = vadd.f32 %v3507_v6, %v2181_v27  ;;  %v3266_v27 = vld [vmem:[%s4383_s6 + $0x68] sm:$0xff] }
 0xa7d   : > { %v2186_v10 = vadd.f32 %v2185_v26, %v2183_v28  ;;  %v3265_v26 = vld [vmem:[%s4383_s6 + $0x60] sm:$0xff] }
 0xa7e   : > { %v3261_v28 = vld [vmem:[%s4382_s5 + $0x60] sm:$0xff] }
 0xa7f   : > { %vm2193_vm11 = vcmp.ge.f32.partialorder %v2186_v10, 0.0  ;;  %v2194_v30 = vmul.f32 %v2188_v19, %v2186_v10 }
 0xa81   : > { %v2195_v31 = vsel %vm2193_vm11, %v2186_v10, %v2194_v30  ;;  %v3652_v10 = vpack.c.bf16 %v3266_v27, %v3265_v26 }
 0xa82   : > { %v2196_v34 = vmul.f32 %v2195_v31, %v4138_v44 }
 0xa84   : > { %v2197_v36 = vadd.f32 %v2196_v34, %v2008_v62  ;;  %v2563_v34 = vstv %s3260_s23  ;;  %s375_s23 = scalar_lea.vmem %s4385_s8, %s3834_s22 }
 0xa86   : > { %2199 = vrot.lane.b32.xlu0 %v2197_v36, %s3739_s21  ;;  %v3633_v38 = vpack.c.bf16 %v2197_v36, %v2192_v37 }
 0xa88   : > { %3634 = vmatprep.subr.bf16.mxu1 %v3633_v38 }
 0xa89   : > { %3636 = vmatpush3.bf16.msra.mxu1 %v3633_v38 }
 0xa8c   : > { %3520 = vmatmul.mubr.msk.f32.vlgmr.msra.gmra.mrb[14].mxu1 %vm1450_vm13, %v3242_v40 }
 0xa8d   : > { %3533 = vmatprep.mubr.msk.f32.mxu1 %vm1450_vm13, %v3251_v56 }
 0xaf8   : > { %v2200_v41 = vpop.permute.xlu0 %2199 }
 0xaf9   : > { %v2202_v43 = vsel %vm400_vm1, %v2192_v37, %v2200_v41 }
 0xafa   : > { %3527 = vmatmul.mubr.msk.f32.vlgmr.msra.gmra.mrb[24].mxu0 %vm1450_vm13, %v2202_v43 }
 0xafb   : > { %3540 = vmatprep.mubr.msk.f32.mxu0 %vm3732_vm0, %v3731_v2  ;;  %3646 = vmatpush3.bf16.msra.mxu0 %v3645_v58 }
 0xafc   : > { %3651 = vmatprep.subr.bf16.mxu0 %v3733_v5 }
 0xb5f   : > { %v3521_v47 = vpop.f32.mrb[14].mxu1 }
 0xb60   : > { %v2278_v48 = vpop.f32.mrb[15].mxu1 }
 0xbcd   : > { %v2359_v49 = vpop.f32.mrb[24].mxu0 }
 0xbce   : > { %v2364_v50 = vadd.f32 %v2359_v49, %v2278_v48  ;;  %2369 = vrot.lane.b32.xlu1 %v2359_v49, %s3738_s28  ;;  %v3528_v51 = vpop.f32.mrb[25].mxu0 }
 0xbcf   : > { %v3262_v51 = vld [vmem:[%s4382_s5 + $0x68] sm:$0xff] }
 0xbd0   : > { %v2367_v61 = vadd.f32 %v2366_v57, %v2364_v50 }
 0xbd2   : > { %v2378_v39 = vmul.f32 %v2377_v59, %v2367_v61  ;;  %vm2376_vm12 = vcmp.ge.f32.partialorder %v2367_v61, 0.0 }
 0xbd4   : > { %v2379_v3 = vsel %vm2376_vm12, %v2367_v61, %v2378_v39  ;;  %v1193_v39 = vmul.f32 %v4020_v7, %v3981_v24 }
 0xbd5   : > { %v2380_v4 = vmul.f32 %v2379_v3, %v4138_v44 }
 0xbd7   : > { %v2381_v12 = vadd.f32 %v2380_v4, %v2192_v37 }
 0xc40   : > { %v2370_v62 = vpop.permute.xlu1 %2369 }
 0xc41   : > { %v2372_v63 = vadd.f32 %v3521_v47, %v2370_v62  ;;  %v1194_v62 = vmul.f32 %v4020_v7, %v3975_v21  ;;  %v1197_v21 = vmul.f32 %v4020_v7, %v4001_v45 }
 0xc43   : > { %v2375_v1 = vadd.f32 %v2374_v52, %v2372_v63  ;;  %v1241_v52 = vsel %vm884_vm3, %v1193_v39, 0.0  ;;  %v1250_v63 = vsel %vm884_vm3, %v4112_v22, 0.0  ;;  %v1286_v22 = vsel %vm884_vm3, %v4116_v23, 0.0 }
 0xc44   : > { %v1273_v4 = vmul.f32 %v4108_v20, %v1197_v21 }
 0xc45   : > { %vm2382_vm8 = vcmp.ge.f32.partialorder %v2375_v1, 0.0  ;;  %v2383_v0 = vmul.f32 %v2377_v59, %v2375_v1 }
 0xc47   : > { %v2384_v6 = vsel %vm2382_vm8, %v2375_v1, %v2383_v0  ;;  %v1195_v1 = vmul.f32 %v4020_v7, %v3991_v35  ;;  %v1198_v35 = vmul.f32 %v4020_v7, %v3997_v42  ;;  %v3275_v42 = vld [vmem:[%s4383_s6 + $0x70] sm:$0xff] }
 0xc48   : > { %v2385_v8 = vmul.f32 %v2384_v6, %v4138_v44  ;;  %v1289_v6 = vsel %vm884_vm3, %v1273_v4, 0.0 }
 0xc49   : > { %v1271_v0 = vmul.f32 %v4108_v20, %v1195_v1 }
 0xc4a   : > { %v2386_v11 = vadd.f32 %v2385_v8, %v2197_v36  ;;  %v1274_v8 = vmul.f32 %v4108_v20, %v1198_v35 }
 0xc4b   : > { %v1283_v24 = vsel %vm884_vm3, %v1271_v0, 0.0 }
 0xc4c   : > { %2388 = vrot.lane.b32.xlu0 %v2386_v11, %s3739_s21  ;;  %v3640_v13 = vpack.c.bf16 %v2386_v11, %v2381_v12 }
 0xc4e   : > { %3641 = vmatprep.subr.bf16.mxu1 %v3640_v13 }
 0xc4f   : > { %3643 = vmatpush3.bf16.msra.mxu1 %v3640_v13  ;;  %v3276_v13 = vld [vmem:[%s4383_s6 + $0x78] sm:$0xff] }
 0xc52   : > { %3534 = vmatmul.mubr.msk.f32.vlgmr.msra.gmra.mrb[16].mxu1 %vm1450_vm13, %v3252_v14  ;;  %v2744_v14 = vstv %s3269_s11 }
 0xc53   : > { %3547 = vmatprep.mubr.msk.f32.mxu1 %vm1450_vm13, %v3261_v28 }
 0xcbe   : > { %v2389_v15 = vpop.permute.xlu0 %2388 }
 0xcbf   : > { %v2391_v60 = vsel %vm400_vm1, %v2381_v12, %v2389_v15 }
 0xcc0   : > { %3541 = vmatmul.mubr.msk.f32.vlgmr.msra.gmra.mrb[26].mxu0 %vm1450_vm13, %v2391_v60  ;;  %v2755_v60 = vstv %s3268_s12 }
 0xcc1   : > { %3554 = vmatprep.mubr.msk.f32.mxu0 %vm3732_vm0, %v3731_v2  ;;  %3653 = vmatpush3.bf16.msra.mxu0 %v3652_v10 }
 0xcc2   : > { %3658 = vmatprep.subr.bf16.mxu0 %v3733_v5 }
 0xd25   : > { %v3535_v16 = vpop.f32.mrb[16].mxu1 }
 0xd26   : > { %v2467_v17 = vpop.f32.mrb[17].mxu1 }
 0xd93   : > { %v2548_v18 = vpop.f32.mrb[26].mxu0 }
 0xd94   : > { %v2553_v19 = vadd.f32 %v2548_v18, %v2467_v17  ;;  %2558 = vrot.lane.b32.xlu1 %v2548_v18, %s3738_s28  ;;  %v3542_v25 = vpop.f32.mrb[27].mxu0  ;;  %v2752_v17 = vstv %s3270_s13 }
 0xd96   : > { %v2556_v30 = vadd.f32 %v2555_v32, %v2553_v19 }
 0xd98   : > { %v2567_v31 = vmul.f32 %v2566_v33, %v2556_v30  ;;  %vm2565_vm9 = vcmp.ge.f32.partialorder %v2556_v30, 0.0 }
 0xd9a   : > { %v2568_v40 = vsel %vm2565_vm9, %v2556_v30, %v2567_v31 }
 0xd9b   : > { %v2569_v43 = vmul.f32 %v2568_v40, %v4138_v44 }
 0xd9d   : > { %v4261_v49 = vadd.f32 %v2569_v43, %v2381_v12  ;;  %v1292_v12 = vsel %vm884_vm3, %v1274_v8, 0.0  ;;  %v1256_v43 = vsel %vm884_vm3, %v1198_v35, 0.0 }
 0xe06   : > { %v2559_v36 = vpop.permute.xlu1 %2558 }
 0xe07   : > { %v2561_v37 = vadd.f32 %v3535_v16, %v2559_v36  ;;  %v1244_v36 = vsel %vm884_vm3, %v1194_v62, 0.0 }
 0xe09   : > { %v2564_v38 = vadd.f32 %v2563_v34, %v2561_v37  ;;  %v3272_v34 = vld [vmem:[%s4382_s5 + $0x78] sm:$0xff]  ;;  %v1247_v37 = vsel %vm884_vm3, %v1195_v1, 0.0 }
 0xe0b   : > { %vm2571_vm10 = vcmp.ge.f32.partialorder %v2564_v38, 0.0  ;;  %v2572_v41 = vmul.f32 %v2566_v33, %v2564_v38 }
 0xe0d   : > { %v2573_v47 = vsel %vm2571_vm10, %v2564_v38, %v2572_v41  ;;  %v1269_v38 = vmul.f32 %v4108_v20, %v1193_v39  ;;  %v1253_v41 = vsel %vm884_vm3, %v1197_v21, 0.0 }
 0xe0e   : > { %v2574_v5 = vmul.f32 %v2573_v47, %v4138_v44  ;;  %v1259_v47 = vsel %vm884_vm3, %v4025_v9, 0.0 }
 0xe0f   : > { %v1277_v40 = vsel %vm884_vm3, %v1269_v38, 0.0 }
 0xe10   : > { %v4259_v48 = vadd.f32 %v2574_v5, %v2386_v11  ;;  %v1200_v11 = vmul.f32 %v4020_v7, %v4009_v55  ;;  %v3271_v55 = vld [vmem:[%s4382_s5 + $0x70] sm:$0xff]  ;;  %v3659_v7 = vpack.c.bf16 %v3276_v13, %v3275_v42 }
 0xe12   : > { %2577 = vrot.lane.b32.xlu0 %v4259_v48, %s3739_s21  ;;  %v3647_v50 = vpack.c.bf16 %v4259_v48, %v4261_v49  ;;  %v1276_v45 = vmul.f32 %v4108_v20, %v1200_v11  ;;  %v1262_v5 = vsel %vm884_vm3, %v1200_v11, 0.0 }
 0xe14   : > { %3648 = vmatprep.subr.bf16.mxu1 %v3647_v50  ;;  %v1298_v23 = vsel %vm884_vm3, %v1276_v45, 0.0 }
 0xe15   : > { %3650 = vmatpush3.bf16.msra.mxu1 %v3647_v50 }
 0xe18   : > { %3548 = vmatmul.mubr.msk.f32.vlgmr.msra.gmra.mrb[18].mxu1 %vm1450_vm13, %v3262_v51 }
 0xe19   : > { %3561 = vmatprep.mubr.msk.f32.mxu1 %vm1450_vm13, %v3271_v55 }
 0xe84   : > { %v2578_v53 = vpop.permute.xlu0 %2577 }
 0xe85   : > { %v2580_v54 = vsel %vm400_vm1, %v4261_v49, %v2578_v53 }
 0xe86   : > { %3555 = vmatmul.mubr.msk.f32.vlgmr.msra.gmra.mrb[28].mxu0 %vm1450_vm13, %v2580_v54 }
 0xe87   : > { %3568 = vmatprep.mubr.msk.f32.mxu0 %vm3732_vm0, %v3731_v2  ;;  %v1270_v2 = vmul.f32 %v4108_v20, %v1194_v62  ;;  %3660 = vmatpush3.bf16.msra.mxu0 %v3659_v7  ;;  %v1295_v20 = vsel %vm884_vm3, %v4120_v29, 0.0  ;;  %v2937_v29 = vstv %s3280_s17  ;;  %v2934_v62 = vstv %s3279_s15 }
 0xe89   : > { %v1280_v3 = vsel %vm884_vm3, %v1270_v2, 0.0 }
 0xeeb   : > { %v3549_v56 = vpop.f32.mrb[18].mxu1 }
 0xeec   : > { %v2656_v58 = vpop.f32.mrb[19].mxu1 }
 0xf59   : > { %v2737_v57 = vpop.f32.mrb[28].mxu0 }
 0xf5a   : > { %v2742_v61 = vadd.f32 %v2737_v57, %v2656_v58  ;;  %2747 = vrot.lane.b32.xlu1 %v2737_v57, %s3738_s28  ;;  %v3556_v59 = vpop.f32.mrb[29].mxu0 }
 0xf5c   : > { %v2745_v15 = vadd.f32 %v2744_v14, %v2742_v61 }
 0xf5e   : > { %v2756_v16 = vmul.f32 %v2755_v60, %v2745_v15  ;;  %vm2754_vm0 = vcmp.ge.f32.partialorder %v2745_v15, 0.0 }
 0xf60   : > { %v2757_v26 = vsel %vm2754_vm0, %v2745_v15, %v2756_v16 }
 0xf61   : > { %v2758_v28 = vmul.f32 %v2757_v26, %v4138_v44 }
 0xf63   : > { %v2759_v33 = vadd.f32 %v2758_v28, %v4261_v49 }
 0xf7e   : > { %1242 = vadd.xlane.f32.xlu1 %v1241_v52  ;;  %v2942_v52 = vstv %s3281_s19 }
 0xf82   : > { %1251 = vadd.xlane.f32.xlu1 %v1250_v63 }
 0xf86   : > { %1281 = vadd.xlane.f32.xlu1 %v1280_v3 }
 0xf8a   : > { %1284 = vadd.xlane.f32.xlu1 %v1283_v24  ;;  %v2935_v24 = vmul.f32 %v2934_v62, %v2759_v33 }
 0xf8e   : > { %1287 = vadd.xlane.f32.xlu1 %v1286_v22 }
 0xf92   : > { %1290 = vadd.xlane.f32.xlu1 %v1289_v6 }
 0xf96   : > { %1293 = vadd.xlane.f32.xlu1 %v1292_v12 }
 0xf9a   : > { %1299 = vadd.xlane.f32.xlu1 %v1298_v23 }
 0xfcc   : > { %v2748_v18 = vpop.permute.xlu1 %2747 }
 0xfcd   : > { %v2750_v19 = vadd.f32 %v3549_v56, %v2748_v18 }
 0xfcf   : > { %v2753_v25 = vadd.f32 %v2752_v17, %v2750_v19 }
 0xfd1   : > { %vm2760_vm11 = vcmp.ge.f32.partialorder %v2753_v25, 0.0  ;;  %v2761_v27 = vmul.f32 %v2755_v60, %v2753_v25 }
 0xfd3   : > { %v2762_v10 = vsel %vm2760_vm11, %v2753_v25, %v2761_v27 }
 0xfd4   : > { %v2763_v32 = vmul.f32 %v2762_v10, %v4138_v44 }
 0xfd6   : > { %v2764_v30 = vadd.f32 %v2763_v32, %v4259_v48 }
 0xfd8   : > { %2766 = vrot.lane.b32.xlu0 %v2764_v30, %s3739_s21  ;;  %v3654_v31 = vpack.c.bf16 %v2764_v30, %v2759_v33  ;;  %s3278_s21 = sld [smem:[#allocation2 + $0x17]]  ;;  %v2938_v2 = vmul.f32 %v2937_v29, %v2764_v30 }
 0xfda   : > { %3655 = vmatprep.subr.bf16.mxu1 %v3654_v31  ;;  %v2939_v22 = vadd.f32 %v2938_v2, %v2935_v24 }
 0xfdb   : > { %3657 = vmatpush3.bf16.msra.mxu1 %v3654_v31 }
 0xfde   : > { %3562 = vmatmul.mubr.msk.f32.vlgmr.msra.gmra.mrb[20].mxu1 %vm1450_vm13, %v3272_v34  ;;  %v2931_v61 = vstv %s3278_s21 }
 0xff7   : > { %1245 = vadd.xlane.f32.xlu0 %v1244_v36 }
 0xffb   : > { %1248 = vadd.xlane.f32.xlu0 %v1247_v37 }
 0xfff   : > { %1278 = vadd.xlane.f32.xlu0 %v1277_v40 }
0x1003   : > { %1254 = vadd.xlane.f32.xlu0 %v1253_v41 }
0x1007   : > { %1257 = vadd.xlane.f32.xlu0 %v1256_v43 }
0x100b   : > { %1260 = vadd.xlane.f32.xlu0 %v1259_v47  ;;  %v1243_v54 = vpop.xlane.xlu1 %1242 }
0x100c   : > { %v2964_v18 = vrot.slane %v1243_v54, %v4039_v46 }
0x100f   : > { %1263 = vadd.xlane.f32.xlu0 %v1262_v5  ;;  %v1252_v56 = vpop.xlane.xlu1 %1251 }
0x1013   : > { %1296 = vadd.xlane.f32.xlu0 %v1295_v20  ;;  %v1282_v1 = vpop.xlane.xlu1 %1281 }
0x1014   : > { %v3017_v42 = vrot.slane %v1282_v1, %v4039_v46 }
0x1017   : > { %v1285_v35 = vpop.xlane.xlu1 %1284 }
0x1018   : > { %v3021_v15 = vrot.slane %v1285_v35, %v4039_v46 }
0x101b   : > { %v1288_v12 = vpop.xlane.xlu1 %1287 }
0x101c   : > { %v3025_v19 = vrot.slane %v1288_v12, %v4039_v46 }
0x101f   : > { %v1291_v13 = vpop.xlane.xlu1 %1290 }
0x1020   : > { %v3029_v10 = vrot.slane %v1291_v13, %v4039_v46 }
0x1023   : > { %v1294_v25 = vpop.xlane.xlu1 %1293 }
0x1024   : > { %v3033_v38 = vrot.slane %v1294_v25, %v4039_v46 }
0x1027   : > { %v1300_v43 = vpop.xlane.xlu1 %1299 }
0x104a   : > { %v2767_v48 = vpop.permute.xlu0 %2766 }
0x104b   : > { %v2769_v49 = vsel %vm400_vm1, %v2759_v33, %v2767_v48  ;;  %v2976_v33 = vrot.slane %v1252_v56, %v4039_v46 }
0x104c   : > { %3569 = vmatmul.mubr.msk.f32.vlgmr.msra.gmra.mrb[30].mxu0 %vm1450_vm13, %v2769_v49 }
0x1084   : > { %v1246_v53 = vpop.xlane.xlu0 %1245 }
0x1088   : > { %v1249_v9 = vpop.xlane.xlu0 %1248 }
0x1089   : > { %v2972_v16 = vrot.slane %v1249_v9, %v4039_v46 }
0x108c   : > { %v1279_v58 = vpop.xlane.xlu0 %1278 }
0x108d   : > { %v3013_v23 = vrot.slane %v1279_v58, %v4039_v46 }
0x108f   : > { %v3042_v55 = vsel %vm1343_vm15, %v3017_v42, %v3013_v23 }
0x1090   : > { %v1255_v3 = vpop.xlane.xlu0 %1254  ;;  %v3043_v17 = vsel %vm1345_vm14, %v3021_v15, %v3042_v55 }
0x1091   : > { %v3044_v27 = vsel %vm1347_vm2, %v3025_v19, %v3043_v17  ;;  %v2980_v30 = vrot.slane %v1255_v3, %v4039_v46 }
0x1092   : > { %v3045_v37 = vsel %vm1349_vm4, %v3029_v10, %v3044_v27 }
0x1093   : > { %v3046_v20 = vsel %vm1351_vm5, %v3033_v38, %v3045_v37 }
0x1094   : > { %v1258_v8 = vpop.xlane.xlu0 %1257 }
0x1095   : > { %v2984_v31 = vrot.slane %v1258_v8, %v4039_v46 }
0x1098   : > { %v1261_v45 = vpop.xlane.xlu0 %1260 }
0x1099   : > { %v2988_v34 = vrot.slane %v1261_v45, %v4039_v46 }
0x109c   : > { %v1264_v7 = vpop.xlane.xlu0 %1263 }
0x109d   : > { %v2992_v41 = vrot.slane %v1264_v7, %v4039_v46 }
0x10a0   : > { %v1297_v28 = vpop.xlane.xlu0 %1296 }
0x10a1   : > { %v3037_v36 = vrot.slane %v1297_v28, %v4039_v46 }
0x10a3   : > { %v3047_v49 = vsel %vm1353_vm6, %v3037_v36, %v3046_v20 }
0x10b1   : > { %v3563_v50 = vpop.f32.mrb[20].mxu1 }
0x10b2   : > { %v2845_v51 = vpop.f32.mrb[21].mxu1 }
0x111f   : > { %v2925_v57 = vpop.f32.mrb[30].mxu0 }
0x1120   : > { %v2929_v59 = vadd.f32 %v2925_v57, %v2845_v51  ;;  %v3570_v39 = vpop.f32.mrb[31].mxu0  ;;  %v3041_v51 = vrot.slane %v1300_v43, %v4039_v46 }
0x1122   : > { %v2932_v63 = vadd.f32 %v2931_v61, %v2929_v59  ;;  %v3048_v9 = vsel %vm1355_vm7, %v3041_v51, %v3047_v49 }
0x1124   : > { %vm2941_vm3 = vcmp.ge.f32.partialorder %v2932_v63, 0.0  ;;  %v2943_v0 = vmul.f32 %v2942_v52, %v2932_v63 }
0x1126   : > { %v2944_v21 = vsel %vm2941_vm3, %v2932_v63, %v2943_v0 }
0x1127   : > { %v2945_v4 = vmul.f32 %v2944_v21, %v4138_v44  ;;  %v2968_v44 = vrot.slane %v1246_v53, %v4039_v46 }
0x1129   : > { %v2946_v6 = vadd.f32 %v2945_v4, %v2939_v22  ;;  %v2993_v26 = vsel %vm1343_vm15, %v2968_v44, %v2964_v18 }
0x112a   : > { %v2994_v32 = vsel %vm1345_vm14, %v2972_v16, %v2993_v26 }
0x112b   : > { %v3282_v11 = vmul.f32 -1.442695, %v2946_v6  ;;  %v2995_v40 = vsel %vm1347_vm2, %v2976_v33, %v2994_v32 }
0x112c   : > { %v2996_v47 = vsel %vm1349_vm4, %v2980_v30, %v2995_v40 }
0x112d   : > { %3695 = vpow2.f32 %v3282_v11  ;;  %v2997_v5 = vsel %vm1351_vm5, %v2984_v31, %v2996_v47 }
0x112e   : > { %v2998_v48 = vsel %vm1353_vm6, %v2988_v34, %v2997_v5 }
0x112f   : > { %v2999_v53 = vsel %vm1355_vm7, %v2992_v41, %v2998_v48 }
0x1137   : > { %v3696_v14 = vpop.eup %3695 }
0x1138   : > { %v2950_v60 = vadd.f32 1.0, %v3696_v14 }
0x113a   : > { %3697 = vrcp.f32 %v2950_v60 }
0x1144   : > { %v3698_v50 = vpop.eup %3697 }
0x1145   : > { %v3001_v54 = vmul.f32 %v3698_v50, %v2999_v53 }
0x1147   : > { %v3050_v56 = vadd.f32 %v3048_v9, %v3001_v54 }
0x1149   : > { %vm3051_vm13 = vcmp.ne.f32.partialorder %v3050_v56, 0.0 }
0x114a   : > { %v3052_v58 = vsel %vm3051_vm13, %v3050_v56, -9e+20 }
0x114b   : > { %v3053_v57 = vsel %vm400_vm1, %v3052_v58, -inf }
0x114c   : > { %3054 = vmax.xlane.f32.xlu0 %v3053_v57 }
0x11d9   : > { %v3055_v61 = vpop.xlane.xlu0 %3054 }
0x11da   : > { %v3056_v29 = vsub.f32 %v3052_v58, %v3055_v61 }
0x11dc   : > { %v3057_v59 = vmul.f32 1.442695, %v3056_v29 }
0x11de   : > { %3699 = vpow2.f32 %v3057_v59 }
0x11e8   : > { %v3700_v39 = vpop.eup %3699 }
0x11e9   : > { %v3059_v52 = vsel %vm400_vm1, %v3700_v39, 0.0 }
0x11ea   : > { %3060 = vadd.xlane.f32.xlu1 %v3059_v52 }
0x1277   : > { %v3061_v46 = vpop.xlane.xlu1 %3060 }
0x1278   : > { %3701 = vrcp.f32 %v3061_v46 }
0x1282   : > { %v3702_v62 = vpop.eup %3701 }
0x1283   : > { %v3063_v63 = vmul.f32 %v3702_v62, %v3700_v39 }
0x1285   : > { %3064 = vst.msk [vmem:[%s375_s23] sm:$0xff] %vm400_vm1, %v3063_v63 }
0x1286 PF: > { %s19_s27 = sadd.s32 1, %s3728_s27  }
0x1287   : > { %p16_p2 = scmp.ge.s32.totalorder %s19_s27, 4  }
0x1289   :  { %18 = sbr.rel (!%p16_p2) target bundleno = 1 (0x1), region = 110 }
0x1290   :  { %3084 = vsyncpa [#allocation3], 1 }
0x1291   :  { %3086 = vsyncpa [#allocation3 + $0x1], 1 }

</bundles_post_ra>
